<compile_context>
chip_gen: v7x
topology: tpu7x:2x2x1
jax: 0.10.0
libtpu: 0.0.40
codegen_flags: <defaults>
</compile_context>

<pallas_src>
import functools
import math

import jax
import jax.numpy as jnp
from jax import lax
from jax.experimental import pallas as pl
from jax.experimental.pallas import tpu as pltpu


# ------------------------------ small helpers --------------------------------
def _nbytes(shape, dtype):
    return int(math.prod(shape)) * jnp.dtype(dtype).itemsize


def _pick_tile(n_batch, m, max_tile_m=16384):
    """Lane tile over the flattened spatial axis.

    Full extent if it fits (fewer, fatter pipeline steps per the v6e feedback),
    otherwise a multiple of 128.  Additionally guarantee >= 2 grid steps so
    both of v7x's TensorCores get work when the batch alone does not provide
    parallelism.
    """
    tile = m if m <= max_tile_m else max_tile_m
    if n_batch * pl.cdiv(m, tile) < 2 and m > 128:
        tile = min(tile, max(128, pl.cdiv(pl.cdiv(m, 2), 128) * 128))
    return tile


def _compiler_params(num_grid_axes, block_bytes, scratch_bytes=0):
    """VMEM budget from the actual working set (double-buffered blocks +
    scratch + margin), kept well under v7x's 64 MiB per-core VMEM."""
    limit = 2 * block_bytes + scratch_bytes + (4 << 20)
    limit = max(8 << 20, min(limit, 56 << 20))
    return pltpu.CompilerParams(
        dimension_semantics=("parallel",) * num_grid_axes,
        vmem_limit_bytes=int(limit),
    )


# ------------------------------ Pallas kernels -------------------------------
def _spatial_in_kernel(xp_ref, wsp_ref, bsp_ref, win_ref, osp_ref, oxf_ref,
                       acc_ref, xf_ref, *, h, w):
    """Fused 3x3 spatial conv (on reflect-padded input) + conv_in 1x1 + ReLU.

    xp_ref : (1, Cin, Hp*Wp) flattened reflect-padded image (Hp=H+2, Wp=W+2)
    wsp_ref: (9, Cout, Cin)  3x3 weights, tap-major (k = ky*3 + kx)
    bsp_ref: (Cout, 1)       spatial conv bias
    win_ref: (mid, Cin)      conv_in weight (bias-free)
    osp_ref: (1, Cout, H*W)  spatial-conv output (dense lane-major)
    oxf_ref: (1, mid,  H*W)  x_fft = relu(conv_in(x))  (kept in f32)
    acc_ref/xf_ref: f32 VMEM scratch in padded-flat coordinates
    """
    wp = w + 2
    length = (h - 1) * wp + w  # last padded-flat index we need, +1

    # 3x3 conv: nine statically-shifted taps of the padded image, each fed to a
    # small (Cout,Cin)@(Cin,L) MXU dot and accumulated in f32.  The im2col
    # patch never touches HBM.
    acc = None
    for k in range(9):
        ky, kx = divmod(k, 3)
        off = ky * wp + kx
        tap = xp_ref[0, :, off:off + length]                         # (Cin, L)
        term = jnp.dot(wsp_ref[k], tap, preferred_element_type=jnp.float32)
        acc = term if acc is None else acc + term
    acc = acc + bsp_ref[...].astype(jnp.float32)                     # (Cout, L)

    # conv_in (1x1, no bias) + ReLU on the centre tap already resident in VMEM:
    # fuses the second full read of x away.
    ctr = xp_ref[0, :, wp + 1:wp + 1 + length]                       # (Cin, L)
    xf = jnp.maximum(
        jnp.dot(win_ref[...], ctr, preferred_element_type=jnp.float32), 0.0)

    acc_ref[...] = acc
    xf_ref[...] = xf

    # Compact padded-flat rows (stride Wp) to dense rows (stride W): pure VMEM
    # shuffling, keeps the HBM writeback lane-dense.
    for r in range(h):
        osp_ref[0, :, r * w:(r + 1) * w] = (
            acc_ref[:, r * wp:r * wp + w].astype(osp_ref.dtype))
        oxf_ref[0, :, r * w:(r + 1) * w] = (
            xf_ref[:, r * wp:r * wp + w].astype(oxf_ref.dtype))


def _freq_kernel(re_ref, im_ref, wrr_ref, wri_ref, wir_ref, wii_ref,
                 br_ref, bi_ref, ore_ref, oim_ref):
    """Frequency-domain 1x1 conv + ReLU on de-interleaved real/imag (all f32)."""
    re = re_ref[0]                                                   # (mid, TM)
    im = im_ref[0]
    out_re = (jnp.dot(wrr_ref[...], re, preferred_element_type=jnp.float32)
              + jnp.dot(wri_ref[...], im, preferred_element_type=jnp.float32)
              + br_ref[...].astype(jnp.float32))
    out_im = (jnp.dot(wir_ref[...], re, preferred_element_type=jnp.float32)
              + jnp.dot(wii_ref[...], im, preferred_element_type=jnp.float32)
              + bi_ref[...].astype(jnp.float32))
    ore_ref[0] = jnp.maximum(out_re, 0.0)
    oim_ref[0] = jnp.maximum(out_im, 0.0)


def _final_kernel(xf_ref, of_ref, sp_ref, w_ref, o_ref):
    """Fused: out = W_out @ (x_fft + out_fft) + out_spatial (f32 accumulation)."""
    s = xf_ref[0] + of_ref[0]                                        # (mid, TM) f32
    acc = jnp.dot(w_ref[...], s, preferred_element_type=jnp.float32)
    o_ref[0] = (acc + sp_ref[0].astype(jnp.float32)).astype(o_ref.dtype)


# ------------------------------ kernel wrappers -------------------------------
def _spatial_in_conv(x_pad_flat, w_taps, b_sp, w_in, *, h, w, out_dtype):
    """Fused spatial 3x3 conv + conv_in.  Grid = (batch,), full image per step.

    Note: full padded image per batch element lives in VMEM; for very large
    H*W one would tile in row bands (halo via element-offset index_map).
    """
    n, c_in, hpwp = x_pad_flat.shape
    c_out = w_taps.shape[1]
    mid = w_in.shape[0]
    hw = h * w
    wp = w + 2
    length = (h - 1) * wp + w

    block_bytes = (_nbytes((1, c_in, hpwp), x_pad_flat.dtype)
                   + _nbytes((9, c_out, c_in), w_taps.dtype)
                   + _nbytes((c_out, 1), b_sp.dtype)
                   + _nbytes((mid, c_in), w_in.dtype)
                   + _nbytes((1, c_out, hw), out_dtype)
                   + _nbytes((1, mid, hw), jnp.float32))
    scratch_bytes = (_nbytes((c_out, length), jnp.float32)
                     + _nbytes((mid, length), jnp.float32))

    return pl.pallas_call(
        functools.partial(_spatial_in_kernel, h=h, w=w),
        out_shape=(jax.ShapeDtypeStruct((n, c_out, hw), out_dtype),
                   jax.ShapeDtypeStruct((n, mid, hw), jnp.float32)),
        grid_spec=pltpu.PrefetchScalarGridSpec(
            num_scalar_prefetch=0,
            grid=(n,),
            in_specs=[
                pl.BlockSpec((1, c_in, hpwp), lambda i: (i, 0, 0)),
                pl.BlockSpec((9, c_out, c_in), lambda i: (0, 0, 0)),
                pl.BlockSpec((c_out, 1), lambda i: (0, 0)),
                pl.BlockSpec((mid, c_in), lambda i: (0, 0)),
            ],
            out_specs=[
                pl.BlockSpec((1, c_out, hw), lambda i: (i, 0, 0)),
                pl.BlockSpec((1, mid, hw), lambda i: (i, 0, 0)),
            ],
            scratch_shapes=[
                pltpu.VMEM((c_out, length), jnp.float32),
                pltpu.VMEM((mid, length), jnp.float32),
            ]),
        compiler_params=_compiler_params(1, block_bytes, scratch_bytes),
    )(x_pad_flat, w_taps, b_sp, w_in)


def _freq_conv(re, im, w_rr, w_ri, w_ir, w_ii, b_re, b_im, *, max_tile_m=16384):
    """Frequency 1x1 conv on (N, mid, H*Wf) real/imag planes, lane-dense, f32."""
    n, mid, m = re.shape
    tm = _pick_tile(n, m, max_tile_m)
    grid = (n, pl.cdiv(m, tm))

    block_bytes = (4 * _nbytes((1, mid, tm), jnp.float32)     # re/im in + out
                   + 4 * _nbytes((mid, mid), w_rr.dtype)
                   + 2 * _nbytes((mid, 1), b_re.dtype))

    data_spec = pl.BlockSpec((1, mid, tm), lambda i, j: (i, 0, j))
    w_spec = pl.BlockSpec((mid, mid), lambda i, j: (0, 0))
    b_spec = pl.BlockSpec((mid, 1), lambda i, j: (0, 0))

    return pl.pallas_call(
        _freq_kernel,
        out_shape=(jax.ShapeDtypeStruct((n, mid, m), jnp.float32),
                   jax.ShapeDtypeStruct((n, mid, m), jnp.float32)),
        grid_spec=pltpu.PrefetchScalarGridSpec(
            num_scalar_prefetch=0,
            grid=grid,
            in_specs=[data_spec, data_spec,
                      w_spec, w_spec, w_spec, w_spec,
                      b_spec, b_spec],
            out_specs=[data_spec, data_spec]),
        compiler_params=_compiler_params(2, block_bytes),
    )(re, im, w_rr, w_ri, w_ir, w_ii, b_re, b_im)


def _final_conv(x_fft, out_fft, out_spatial, w_out, *, max_tile_m=16384):
    """out = w_out @ (x_fft + out_fft) + out_spatial, all (N, C, M) lane-dense."""
    n, mid, m = x_fft.shape
    c_out = w_out.shape[0]
    tm = _pick_tile(n, m, max_tile_m)
    grid = (n, pl.cdiv(m, tm))

    block_bytes = (2 * _nbytes((1, mid, tm), jnp.float32)
                   + 2 * _nbytes((1, c_out, tm), out_spatial.dtype)
                   + _nbytes((c_out, mid), w_out.dtype))

    return pl.pallas_call(
        _final_kernel,
        out_shape=jax.ShapeDtypeStruct((n, c_out, m), out_spatial.dtype),
        grid_spec=pltpu.PrefetchScalarGridSpec(
            num_scalar_prefetch=0,
            grid=grid,
            in_specs=[
                pl.BlockSpec((1, mid, tm), lambda i, j: (i, 0, j)),
                pl.BlockSpec((1, mid, tm), lambda i, j: (i, 0, j)),
                pl.BlockSpec((1, c_out, tm), lambda i, j: (i, 0, j)),
                pl.BlockSpec((c_out, mid), lambda i, j: (0, 0)),
            ],
            out_specs=pl.BlockSpec((1, c_out, tm), lambda i, j: (i, 0, j))),
        compiler_params=_compiler_params(2, block_bytes),
    )(x_fft, out_fft, out_spatial, w_out)


# --------------------------------- forward -----------------------------------
def spatial_freq_conv(x, params, *, fft_norm="ortho"):
    """Forward pass of SpatialFreqConv on NCHW input (norm_type=None, act=ReLU)."""
    n, c_in, h, w = x.shape
    w_sp, b_sp = params["spatial_w"], params["spatial_b"]    # (Cout,Cin,3,3),(Cout,)
    w_in = params["conv_in_w"]                               # (mid, Cin), no bias
    w_c, b_c = params["conv_w"], params["conv_b"]            # (2mid, 2mid), (2mid,)
    w_out = params["conv_out_w"]                             # (Cout, mid), no bias

    c_out = w_sp.shape[0]
    mid = w_in.shape[0]
    hw = h * w
    hp, wp = h + 2, w + 2

    # Reflect-pad once; the flatten to (N, Cin, Hp*Wp) is a free metadata reshape.
    x_pad = jnp.pad(x, ((0, 0), (0, 0), (1, 1), (1, 1)), mode="reflect")
    x_pad_flat = x_pad.reshape(n, c_in, hp * wp)

    # Tap-major 3x3 weights: w_taps[ky*3 + kx] = w_sp[:, :, ky, kx].
    w_taps = jnp.transpose(w_sp, (2, 3, 0, 1)).reshape(9, c_out, c_in)

    # Fused spatial 3x3 conv + conv_in(1x1, no bias) + ReLU: one read of x_pad.
    out_spatial, x_fft = _spatial_in_conv(
        x_pad_flat, w_taps, b_sp.reshape(c_out, 1), w_in,
        h=h, w=w, out_dtype=x.dtype)            # (N,Cout,HW), (N,mid,HW) f32

    # --- frequency branch (kept in f32 throughout) ---
    # TODO(synk): 2-D real FFT / inverse FFT have no Pallas TPU equivalent; jnp.fft used.
    ffted = jnp.fft.rfftn(x_fft.reshape(n, mid, h, w), axes=(-2, -1), norm=fft_norm)
    wf = ffted.shape[-1]
    re = jnp.real(ffted).reshape(n, mid, h * wf)                     # f32
    im = jnp.imag(ffted).reshape(n, mid, h * wf)                     # f32

    # De-interleave the (2*mid, 2*mid) 1x1 conv of the 'B (C L) H W' layout:
    # input channel 2c is Re(c), 2c+1 is Im(c); output rows likewise.
    w_rr, w_ri = w_c[0::2, 0::2], w_c[0::2, 1::2]
    w_ir, w_ii = w_c[1::2, 0::2], w_c[1::2, 1::2]
    b_re, b_im = b_c[0::2].reshape(mid, 1), b_c[1::2].reshape(mid, 1)

    re_o, im_o = _freq_conv(re, im, w_rr, w_ri, w_ir, w_ii, b_re, b_im)
    cplx = lax.complex(re_o.reshape(n, mid, h, wf), im_o.reshape(n, mid, h, wf))
    out_fft = jnp.fft.irfftn(cplx, s=(h, w), axes=(-2, -1), norm=fft_norm)
    out_fft = out_fft.reshape(n, mid, hw)                            # f32

    # --- fused: conv_out(x_fft + out_fft) + out_spatial ---
    out = _final_conv(x_fft, out_fft, out_spatial, w_out)            # (N, Cout, HW)
    return out.reshape(n, c_out, h, w)


# ----------------------------- deterministic init ----------------------------
def init_params(key, in_channels, out_channels, reduction=2):
    mid = out_channels // reduction
    ks = jax.random.split(key, 6)

    def wn(k, shape, fan_in):
        return jax.random.normal(k, shape, jnp.float32) * (1.0 / math.sqrt(fan_in))

    return dict(
        spatial_w=wn(ks[0], (out_channels, in_channels, 3, 3), in_channels * 9),
        spatial_b=jax.random.normal(ks[1], (out_channels,), jnp.float32) * 0.1,
        conv_in_w=wn(ks[2], (mid, in_channels), in_channels),
        conv_w=wn(ks[3], (2 * mid, 2 * mid), 2 * mid),
        conv_b=jax.random.normal(ks[4], (2 * mid,), jnp.float32) * 0.1,
        conv_out_w=wn(ks[5], (out_channels, mid), mid),
    )


# ----------------------------- reference (pure JAX) ---------------------------
def spatial_freq_conv_reference(x, params, fft_norm="ortho"):
    w_sp, b_sp = params["spatial_w"], params["spatial_b"]
    w_in = params["conv_in_w"]
    w_c, b_c = params["conv_w"], params["conv_b"]
    w_out = params["conv_out_w"]
    n, c_in, h, w = x.shape
    mid = w_in.shape[0]
    hi = lax.Precision.HIGHEST

    x_pad = jnp.pad(x, ((0, 0), (0, 0), (1, 1), (1, 1)), mode="reflect")
    out = lax.conv_general_dilated(
        x_pad, w_sp, window_strides=(1, 1), padding="VALID",
        dimension_numbers=("NCHW", "OIHW", "NCHW"), precision=hi)
    out = out + b_sp[None, :, None, None]

    x_fft = jnp.maximum(jnp.einsum("nchw,oc->nohw", x, w_in, precision=hi), 0.0)

    ffted = jnp.fft.rfftn(x_fft, axes=(-2, -1), norm=fft_norm)
    wf = ffted.shape[-1]
    st = jnp.stack([ffted.real, ffted.imag], axis=2).reshape(n, 2 * mid, h, wf)
    f = jnp.einsum("nchw,oc->nohw", st, w_c, precision=hi) + b_c[None, :, None, None]
    f = jnp.maximum(f, 0.0)
    f = f.reshape(n, mid, 2, h, wf)
    cplx = lax.complex(f[:, :, 0], f[:, :, 1])
    out_fft = jnp.fft.irfftn(cplx, s=(h, w), axes=(-2, -1), norm=fft_norm)

    out_fft = jnp.einsum("nchw,oc->nohw", x_fft + out_fft, w_out, precision=hi)
    return out + out_fft


if __name__ == "__main__":
    key = jax.random.PRNGKey(0)
    k_x, k_p = jax.random.split(key)

    in_channels = 4
    out_channels = 4
    reduction = 2  # mid_channels = 2

    x = jax.random.normal(k_x, (2, in_channels, 16, 16), jnp.float32)
    params = init_params(k_p, in_channels, out_channels, reduction)

    out = spatial_freq_conv(x, params)
    out = jax.block_until_ready(out)

    ref = spatial_freq_conv_reference(x, params)
    assert out.shape == (2, out_channels, 16, 16)
    err = float(jnp.max(jnp.abs(out - ref)))
    assert jnp.allclose(out, ref, atol=2e-4, rtol=2e-4), f"max abs err = {err}"

    print("KERNEL_OK")
</pallas_src>

<mosaic_0001>
module attributes {stable_mosaic.version = 11 : i64} {
  func.func @_spatial_in_kernel(%arg0: i32, %arg1: memref<1x4x324xf32, #tpu.memory_space<vmem>>, %arg2: memref<9x4x4xf32, #tpu.memory_space<vmem>>, %arg3: memref<4x1xf32, #tpu.memory_space<vmem>>, %arg4: memref<2x4xf32, #tpu.memory_space<vmem>>, %arg5: memref<1x4x256xf32, #tpu.memory_space<vmem>>, %arg6: memref<1x2x256xf32, #tpu.memory_space<vmem>>, %arg7: memref<4x286xf32, #tpu.memory_space<vmem>>, %arg8: memref<2x286xf32, #tpu.memory_space<vmem>>) attributes {dimension_semantics = [#tpu.dimension_semantics<parallel>], iteration_bounds = array<i64: 2>, scalar_prefetch = 0 : i64, scratch_operands = 2 : i64, tpu.core_type = #tpu.core_type<tc>, window_params = [{transform_indices = @transform_0, window_bounds = array<i64: 1, 4, 324>}, {pipeline_mode = #tpu.pipeline_mode<synchronous>, transform_indices = @transform_1, window_bounds = array<i64: 9, 4, 4>}, {pipeline_mode = #tpu.pipeline_mode<synchronous>, transform_indices = @transform_2, window_bounds = array<i64: 4, 1>}, {pipeline_mode = #tpu.pipeline_mode<synchronous>, transform_indices = @transform_3, window_bounds = array<i64: 2, 4>}, {transform_indices = @transform_4, window_bounds = array<i64: 1, 4, 256>}, {transform_indices = @transform_5, window_bounds = array<i64: 1, 2, 256>}]} {
    %c0 = arith.constant 0 : index
    %c0_0 = arith.constant 0 : index
    %c0_1 = arith.constant 0 : index
    %0 = vector.load %arg1[%c0, %c0_0, %c0_1] : memref<1x4x324xf32, #tpu.memory_space<vmem>>, vector<1x4x286xf32>
    %1 = vector.shape_cast %0 : vector<1x4x286xf32> to vector<4x286xf32>
    %c0_2 = arith.constant 0 : index
    %c0_3 = arith.constant 0 : index
    %c0_4 = arith.constant 0 : index
    %2 = vector.load %arg2[%c0_2, %c0_3, %c0_4] : memref<9x4x4xf32, #tpu.memory_space<vmem>>, vector<1x4x4xf32>
    %3 = vector.shape_cast %2 : vector<1x4x4xf32> to vector<4x4xf32>
    %cst = arith.constant dense<0.000000e+00> : vector<4x286xf32>
    %4 = tpu.matmul %3, %1, %cst {dimension_numbers = #tpu.dot_dimension_numbers<[1], [0], [0], [1], [0, 0, 1, 1], [], []>} : vector<4x4xf32>, vector<4x286xf32>, vector<4x286xf32> -> vector<4x286xf32>
    %c0_5 = arith.constant 0 : index
    %c0_6 = arith.constant 0 : index
    %c1 = arith.constant 1 : index
    %5 = vector.load %arg1[%c0_5, %c0_6, %c1] : memref<1x4x324xf32, #tpu.memory_space<vmem>>, vector<1x4x286xf32>
    %6 = vector.shape_cast %5 : vector<1x4x286xf32> to vector<4x286xf32>
    %c1_7 = arith.constant 1 : index
    %c0_8 = arith.constant 0 : index
    %c0_9 = arith.constant 0 : index
    %7 = vector.load %arg2[%c1_7, %c0_8, %c0_9] : memref<9x4x4xf32, #tpu.memory_space<vmem>>, vector<1x4x4xf32>
    %8 = vector.shape_cast %7 : vector<1x4x4xf32> to vector<4x4xf32>
    %cst_10 = arith.constant dense<0.000000e+00> : vector<4x286xf32>
    %9 = tpu.matmul %8, %6, %cst_10 {dimension_numbers = #tpu.dot_dimension_numbers<[1], [0], [0], [1], [0, 0, 1, 1], [], []>} : vector<4x4xf32>, vector<4x286xf32>, vector<4x286xf32> -> vector<4x286xf32>
    %10 = arith.addf %4, %9 : vector<4x286xf32>
    %c0_11 = arith.constant 0 : index
    %c0_12 = arith.constant 0 : index
    %c2 = arith.constant 2 : index
    %11 = vector.load %arg1[%c0_11, %c0_12, %c2] : memref<1x4x324xf32, #tpu.memory_space<vmem>>, vector<1x4x286xf32>
    %12 = vector.shape_cast %11 : vector<1x4x286xf32> to vector<4x286xf32>
    %c2_13 = arith.constant 2 : index
    %c0_14 = arith.constant 0 : index
    %c0_15 = arith.constant 0 : index
    %13 = vector.load %arg2[%c2_13, %c0_14, %c0_15] : memref<9x4x4xf32, #tpu.memory_space<vmem>>, vector<1x4x4xf32>
    %14 = vector.shape_cast %13 : vector<1x4x4xf32> to vector<4x4xf32>
    %cst_16 = arith.constant dense<0.000000e+00> : vector<4x286xf32>
    %15 = tpu.matmul %14, %12, %cst_16 {dimension_numbers = #tpu.dot_dimension_numbers<[1], [0], [0], [1], [0, 0, 1, 1], [], []>} : vector<4x4xf32>, vector<4x286xf32>, vector<4x286xf32> -> vector<4x286xf32>
    %16 = arith.addf %10, %15 : vector<4x286xf32>
    %c0_17 = arith.constant 0 : index
    %c0_18 = arith.constant 0 : index
    %c18 = arith.constant 18 : index
    %17 = vector.load %arg1[%c0_17, %c0_18, %c18] : memref<1x4x324xf32, #tpu.memory_space<vmem>>, vector<1x4x286xf32>
    %18 = vector.shape_cast %17 : vector<1x4x286xf32> to vector<4x286xf32>
    %c3 = arith.constant 3 : index
    %c0_19 = arith.constant 0 : index
    %c0_20 = arith.constant 0 : index
    %19 = vector.load %arg2[%c3, %c0_19, %c0_20] : memref<9x4x4xf32, #tpu.memory_space<vmem>>, vector<1x4x4xf32>
    %20 = vector.shape_cast %19 : vector<1x4x4xf32> to vector<4x4xf32>
    %cst_21 = arith.constant dense<0.000000e+00> : vector<4x286xf32>
    %21 = tpu.matmul %20, %18, %cst_21 {dimension_numbers = #tpu.dot_dimension_numbers<[1], [0], [0], [1], [0, 0, 1, 1], [], []>} : vector<4x4xf32>, vector<4x286xf32>, vector<4x286xf32> -> vector<4x286xf32>
    %22 = arith.addf %16, %21 : vector<4x286xf32>
    %c0_22 = arith.constant 0 : index
    %c0_23 = arith.constant 0 : index
    %c19 = arith.constant 19 : index
    %23 = vector.load %arg1[%c0_22, %c0_23, %c19] : memref<1x4x324xf32, #tpu.memory_space<vmem>>, vector<1x4x286xf32>
    %24 = vector.shape_cast %23 : vector<1x4x286xf32> to vector<4x286xf32>
    %c4 = arith.constant 4 : index
    %c0_24 = arith.constant 0 : index
    %c0_25 = arith.constant 0 : index
    %25 = vector.load %arg2[%c4, %c0_24, %c0_25] : memref<9x4x4xf32, #tpu.memory_space<vmem>>, vector<1x4x4xf32>
    %26 = vector.shape_cast %25 : vector<1x4x4xf32> to vector<4x4xf32>
    %cst_26 = arith.constant dense<0.000000e+00> : vector<4x286xf32>
    %27 = tpu.matmul %26, %24, %cst_26 {dimension_numbers = #tpu.dot_dimension_numbers<[1], [0], [0], [1], [0, 0, 1, 1], [], []>} : vector<4x4xf32>, vector<4x286xf32>, vector<4x286xf32> -> vector<4x286xf32>
    %28 = arith.addf %22, %27 : vector<4x286xf32>
    %c0_27 = arith.constant 0 : index
    %c0_28 = arith.constant 0 : index
    %c20 = arith.constant 20 : index
    %29 = vector.load %arg1[%c0_27, %c0_28, %c20] : memref<1x4x324xf32, #tpu.memory_space<vmem>>, vector<1x4x286xf32>
    %30 = vector.shape_cast %29 : vector<1x4x286xf32> to vector<4x286xf32>
    %c5 = arith.constant 5 : index
    %c0_29 = arith.constant 0 : index
    %c0_30 = arith.constant 0 : index
    %31 = vector.load %arg2[%c5, %c0_29, %c0_30] : memref<9x4x4xf32, #tpu.memory_space<vmem>>, vector<1x4x4xf32>
    %32 = vector.shape_cast %31 : vector<1x4x4xf32> to vector<4x4xf32>
    %cst_31 = arith.constant dense<0.000000e+00> : vector<4x286xf32>
    %33 = tpu.matmul %32, %30, %cst_31 {dimension_numbers = #tpu.dot_dimension_numbers<[1], [0], [0], [1], [0, 0, 1, 1], [], []>} : vector<4x4xf32>, vector<4x286xf32>, vector<4x286xf32> -> vector<4x286xf32>
    %34 = arith.addf %28, %33 : vector<4x286xf32>
    %c0_32 = arith.constant 0 : index
    %c0_33 = arith.constant 0 : index
    %c36 = arith.constant 36 : index
    %35 = vector.load %arg1[%c0_32, %c0_33, %c36] : memref<1x4x324xf32, #tpu.memory_space<vmem>>, vector<1x4x286xf32>
    %36 = vector.shape_cast %35 : vector<1x4x286xf32> to vector<4x286xf32>
    %c6 = arith.constant 6 : index
    %c0_34 = arith.constant 0 : index
    %c0_35 = arith.constant 0 : index
    %37 = vector.load %arg2[%c6, %c0_34, %c0_35] : memref<9x4x4xf32, #tpu.memory_space<vmem>>, vector<1x4x4xf32>
    %38 = vector.shape_cast %37 : vector<1x4x4xf32> to vector<4x4xf32>
    %cst_36 = arith.constant dense<0.000000e+00> : vector<4x286xf32>
    %39 = tpu.matmul %38, %36, %cst_36 {dimension_numbers = #tpu.dot_dimension_numbers<[1], [0], [0], [1], [0, 0, 1, 1], [], []>} : vector<4x4xf32>, vector<4x286xf32>, vector<4x286xf32> -> vector<4x286xf32>
    %40 = arith.addf %34, %39 : vector<4x286xf32>
    %c0_37 = arith.constant 0 : index
    %c0_38 = arith.constant 0 : index
    %c37 = arith.constant 37 : index
    %41 = vector.load %arg1[%c0_37, %c0_38, %c37] : memref<1x4x324xf32, #tpu.memory_space<vmem>>, vector<1x4x286xf32>
    %42 = vector.shape_cast %41 : vector<1x4x286xf32> to vector<4x286xf32>
    %c7 = arith.constant 7 : index
    %c0_39 = arith.constant 0 : index
    %c0_40 = arith.constant 0 : index
    %43 = vector.load %arg2[%c7, %c0_39, %c0_40] : memref<9x4x4xf32, #tpu.memory_space<vmem>>, vector<1x4x4xf32>
    %44 = vector.shape_cast %43 : vector<1x4x4xf32> to vector<4x4xf32>
    %cst_41 = arith.constant dense<0.000000e+00> : vector<4x286xf32>
    %45 = tpu.matmul %44, %42, %cst_41 {dimension_numbers = #tpu.dot_dimension_numbers<[1], [0], [0], [1], [0, 0, 1, 1], [], []>} : vector<4x4xf32>, vector<4x286xf32>, vector<4x286xf32> -> vector<4x286xf32>
    %46 = arith.addf %40, %45 : vector<4x286xf32>
    %c0_42 = arith.constant 0 : index
    %c0_43 = arith.constant 0 : index
    %c38 = arith.constant 38 : index
    %47 = vector.load %arg1[%c0_42, %c0_43, %c38] : memref<1x4x324xf32, #tpu.memory_space<vmem>>, vector<1x4x286xf32>
    %48 = vector.shape_cast %47 : vector<1x4x286xf32> to vector<4x286xf32>
    %c8 = arith.constant 8 : index
    %c0_44 = arith.constant 0 : index
    %c0_45 = arith.constant 0 : index
    %49 = vector.load %arg2[%c8, %c0_44, %c0_45] : memref<9x4x4xf32, #tpu.memory_space<vmem>>, vector<1x4x4xf32>
    %50 = vector.shape_cast %49 : vector<1x4x4xf32> to vector<4x4xf32>
    %cst_46 = arith.constant dense<0.000000e+00> : vector<4x286xf32>
    %51 = tpu.matmul %50, %48, %cst_46 {dimension_numbers = #tpu.dot_dimension_numbers<[1], [0], [0], [1], [0, 0, 1, 1], [], []>} : vector<4x4xf32>, vector<4x286xf32>, vector<4x286xf32> -> vector<4x286xf32>
    %52 = arith.addf %46, %51 : vector<4x286xf32>
    %c0_47 = arith.constant 0 : index
    %c0_48 = arith.constant 0 : index
    %53 = vector.load %arg3[%c0_47, %c0_48] : memref<4x1xf32, #tpu.memory_space<vmem>>, vector<4x1xf32>
    %54 = vector.broadcast %53 : vector<4x1xf32> to vector<4x286xf32>
    %55 = arith.addf %52, %54 : vector<4x286xf32>
    %c0_49 = arith.constant 0 : index
    %c0_50 = arith.constant 0 : index
    %c19_51 = arith.constant 19 : index
    %56 = vector.load %arg1[%c0_49, %c0_50, %c19_51] : memref<1x4x324xf32, #tpu.memory_space<vmem>>, vector<1x4x286xf32>
    %57 = vector.shape_cast %56 : vector<1x4x286xf32> to vector<4x286xf32>
    %c0_52 = arith.constant 0 : index
    %c0_53 = arith.constant 0 : index
    %58 = vector.load %arg4[%c0_52, %c0_53] : memref<2x4xf32, #tpu.memory_space<vmem>>, vector<2x4xf32>
    %cst_54 = arith.constant dense<0.000000e+00> : vector<2x286xf32>
    %59 = tpu.matmul %58, %57, %cst_54 {dimension_numbers = #tpu.dot_dimension_numbers<[1], [0], [0], [1], [0, 0, 1, 1], [], []>} : vector<2x4xf32>, vector<4x286xf32>, vector<2x286xf32> -> vector<2x286xf32>
    %cst_55 = arith.constant 0.000000e+00 : f32
    %60 = vector.broadcast %cst_55 : f32 to vector<2x286xf32>
    %61 = arith.maximumf %59, %60 : vector<2x286xf32>
    %c0_56 = arith.constant 0 : index
    %c0_57 = arith.constant 0 : index
    %62 = vector.load %arg7[%c0_56, %c0_57] : memref<4x286xf32, #tpu.memory_space<vmem>>, vector<4x286xf32>
    tpu.vector_store %arg7[%c0_56, %c0_57], %55 {strides = array<i32>} : memref<4x286xf32, #tpu.memory_space<vmem>>, vector<4x286xf32>,
    %c0_58 = arith.constant 0 : index
    %c0_59 = arith.constant 0 : index
    %63 = vector.load %arg8[%c0_58, %c0_59] : memref<2x286xf32, #tpu.memory_space<vmem>>, vector<2x286xf32>
    tpu.vector_store %arg8[%c0_58, %c0_59], %61 {strides = array<i32>} : memref<2x286xf32, #tpu.memory_space<vmem>>, vector<2x286xf32>,
    %c0_60 = arith.constant 0 : index
    %c0_61 = arith.constant 0 : index
    %64 = vector.load %arg7[%c0_60, %c0_61] : memref<4x286xf32, #tpu.memory_space<vmem>>, vector<4x16xf32>
    %c0_62 = arith.constant 0 : index
    %c0_63 = arith.constant 0 : index
    %c0_64 = arith.constant 0 : index
    %65 = vector.load %arg5[%c0_62, %c0_63, %c0_64] : memref<1x4x256xf32, #tpu.memory_space<vmem>>, vector<1x4x16xf32>
    %66 = vector.shape_cast %65 : vector<1x4x16xf32> to vector<4x16xf32>
    %67 = vector.shape_cast %64 : vector<4x16xf32> to vector<1x4x16xf32>
    tpu.vector_store %arg5[%c0_62, %c0_63, %c0_64], %67 {strides = array<i32>} : memref<1x4x256xf32, #tpu.memory_space<vmem>>, vector<1x4x16xf32>,
    %c0_65 = arith.constant 0 : index
    %c0_66 = arith.constant 0 : index
    %68 = vector.load %arg8[%c0_65, %c0_66] : memref<2x286xf32, #tpu.memory_space<vmem>>, vector<2x16xf32>
    %c0_67 = arith.constant 0 : index
    %c0_68 = arith.constant 0 : index
    %c0_69 = arith.constant 0 : index
    %69 = vector.load %arg6[%c0_67, %c0_68, %c0_69] : memref<1x2x256xf32, #tpu.memory_space<vmem>>, vector<1x2x16xf32>
    %70 = vector.shape_cast %69 : vector<1x2x16xf32> to vector<2x16xf32>
    %71 = vector.shape_cast %68 : vector<2x16xf32> to vector<1x2x16xf32>
    tpu.vector_store %arg6[%c0_67, %c0_68, %c0_69], %71 {strides = array<i32>} : memref<1x2x256xf32, #tpu.memory_space<vmem>>, vector<1x2x16xf32>,
    %c0_70 = arith.constant 0 : index
    %c18_71 = arith.constant 18 : index
    %72 = vector.load %arg7[%c0_70, %c18_71] : memref<4x286xf32, #tpu.memory_space<vmem>>, vector<4x16xf32>
    %c0_72 = arith.constant 0 : index
    %c0_73 = arith.constant 0 : index
    %c16 = arith.constant 16 : index
    %73 = vector.load %arg5[%c0_72, %c0_73, %c16] : memref<1x4x256xf32, #tpu.memory_space<vmem>>, vector<1x4x16xf32>
    %74 = vector.shape_cast %73 : vector<1x4x16xf32> to vector<4x16xf32>
    %75 = vector.shape_cast %72 : vector<4x16xf32> to vector<1x4x16xf32>
    tpu.vector_store %arg5[%c0_72, %c0_73, %c16], %75 {strides = array<i32>} : memref<1x4x256xf32, #tpu.memory_space<vmem>>, vector<1x4x16xf32>,
    %c0_74 = arith.constant 0 : index
    %c18_75 = arith.constant 18 : index
    %76 = vector.load %arg8[%c0_74, %c18_75] : memref<2x286xf32, #tpu.memory_space<vmem>>, vector<2x16xf32>
    %c0_76 = arith.constant 0 : index
    %c0_77 = arith.constant 0 : index
    %c16_78 = arith.constant 16 : index
    %77 = vector.load %arg6[%c0_76, %c0_77, %c16_78] : memref<1x2x256xf32, #tpu.memory_space<vmem>>, vector<1x2x16xf32>
    %78 = vector.shape_cast %77 : vector<1x2x16xf32> to vector<2x16xf32>
    %79 = vector.shape_cast %76 : vector<2x16xf32> to vector<1x2x16xf32>
    tpu.vector_store %arg6[%c0_76, %c0_77, %c16_78], %79 {strides = array<i32>} : memref<1x2x256xf32, #tpu.memory_space<vmem>>, vector<1x2x16xf32>,
    %c0_79 = arith.constant 0 : index
    %c36_80 = arith.constant 36 : index
    %80 = vector.load %arg7[%c0_79, %c36_80] : memref<4x286xf32, #tpu.memory_space<vmem>>, vector<4x16xf32>
    %c0_81 = arith.constant 0 : index
    %c0_82 = arith.constant 0 : index
    %c32 = arith.constant 32 : index
    %81 = vector.load %arg5[%c0_81, %c0_82, %c32] : memref<1x4x256xf32, #tpu.memory_space<vmem>>, vector<1x4x16xf32>
    %82 = vector.shape_cast %81 : vector<1x4x16xf32> to vector<4x16xf32>
    %83 = vector.shape_cast %80 : vector<4x16xf32> to vector<1x4x16xf32>
    tpu.vector_store %arg5[%c0_81, %c0_82, %c32], %83 {strides = array<i32>} : memref<1x4x256xf32, #tpu.memory_space<vmem>>, vector<1x4x16xf32>,
    %c0_83 = arith.constant 0 : index
    %c36_84 = arith.constant 36 : index
    %84 = vector.load %arg8[%c0_83, %c36_84] : memref<2x286xf32, #tpu.memory_space<vmem>>, vector<2x16xf32>
    %c0_85 = arith.constant 0 : index
    %c0_86 = arith.constant 0 : index
    %c32_87 = arith.constant 32 : index
    %85 = vector.load %arg6[%c0_85, %c0_86, %c32_87] : memref<1x2x256xf32, #tpu.memory_space<vmem>>, vector<1x2x16xf32>
    %86 = vector.shape_cast %85 : vector<1x2x16xf32> to vector<2x16xf32>
    %87 = vector.shape_cast %84 : vector<2x16xf32> to vector<1x2x16xf32>
    tpu.vector_store %arg6[%c0_85, %c0_86, %c32_87], %87 {strides = array<i32>} : memref<1x2x256xf32, #tpu.memory_space<vmem>>, vector<1x2x16xf32>,
    %c0_88 = arith.constant 0 : index
    %c54 = arith.constant 54 : index
    %88 = vector.load %arg7[%c0_88, %c54] : memref<4x286xf32, #tpu.memory_space<vmem>>, vector<4x16xf32>
    %c0_89 = arith.constant 0 : index
    %c0_90 = arith.constant 0 : index
    %c48 = arith.constant 48 : index
    %89 = vector.load %arg5[%c0_89, %c0_90, %c48] : memref<1x4x256xf32, #tpu.memory_space<vmem>>, vector<1x4x16xf32>
    %90 = vector.shape_cast %89 : vector<1x4x16xf32> to vector<4x16xf32>
    %91 = vector.shape_cast %88 : vector<4x16xf32> to vector<1x4x16xf32>
    tpu.vector_store %arg5[%c0_89, %c0_90, %c48], %91 {strides = array<i32>} : memref<1x4x256xf32, #tpu.memory_space<vmem>>, vector<1x4x16xf32>,
    %c0_91 = arith.constant 0 : index
    %c54_92 = arith.constant 54 : index
    %92 = vector.load %arg8[%c0_91, %c54_92] : memref<2x286xf32, #tpu.memory_space<vmem>>, vector<2x16xf32>
    %c0_93 = arith.constant 0 : index
    %c0_94 = arith.constant 0 : index
    %c48_95 = arith.constant 48 : index
    %93 = vector.load %arg6[%c0_93, %c0_94, %c48_95] : memref<1x2x256xf32, #tpu.memory_space<vmem>>, vector<1x2x16xf32>
    %94 = vector.shape_cast %93 : vector<1x2x16xf32> to vector<2x16xf32>
    %95 = vector.shape_cast %92 : vector<2x16xf32> to vector<1x2x16xf32>
    tpu.vector_store %arg6[%c0_93, %c0_94, %c48_95], %95 {strides = array<i32>} : memref<1x2x256xf32, #tpu.memory_space<vmem>>, vector<1x2x16xf32>,
    %c0_96 = arith.constant 0 : index
    %c72 = arith.constant 72 : index
    %96 = vector.load %arg7[%c0_96, %c72] : memref<4x286xf32, #tpu.memory_space<vmem>>, vector<4x16xf32>
    %c0_97 = arith.constant 0 : index
    %c0_98 = arith.constant 0 : index
    %c64 = arith.constant 64 : index
    %97 = vector.load %arg5[%c0_97, %c0_98, %c64] : memref<1x4x256xf32, #tpu.memory_space<vmem>>, vector<1x4x16xf32>
    %98 = vector.shape_cast %97 : vector<1x4x16xf32> to vector<4x16xf32>
    %99 = vector.shape_cast %96 : vector<4x16xf32> to vector<1x4x16xf32>
    tpu.vector_store %arg5[%c0_97, %c0_98, %c64], %99 {strides = array<i32>} : memref<1x4x256xf32, #tpu.memory_space<vmem>>, vector<1x4x16xf32>,
    %c0_99 = arith.constant 0 : index
    %c72_100 = arith.constant 72 : index
    %100 = vector.load %arg8[%c0_99, %c72_100] : memref<2x286xf32, #tpu.memory_space<vmem>>, vector<2x16xf32>
    %c0_101 = arith.constant 0 : index
    %c0_102 = arith.constant 0 : index
    %c64_103 = arith.constant 64 : index
    %101 = vector.load %arg6[%c0_101, %c0_102, %c64_103] : memref<1x2x256xf32, #tpu.memory_space<vmem>>, vector<1x2x16xf32>
    %102 = vector.shape_cast %101 : vector<1x2x16xf32> to vector<2x16xf32>
    %103 = vector.shape_cast %100 : vector<2x16xf32> to vector<1x2x16xf32>
    tpu.vector_store %arg6[%c0_101, %c0_102, %c64_103], %103 {strides = array<i32>} : memref<1x2x256xf32, #tpu.memory_space<vmem>>, vector<1x2x16xf32>,
    %c0_104 = arith.constant 0 : index
    %c90 = arith.constant 90 : index
    %104 = vector.load %arg7[%c0_104, %c90] : memref<4x286xf32, #tpu.memory_space<vmem>>, vector<4x16xf32>
    %c0_105 = arith.constant 0 : index
    %c0_106 = arith.constant 0 : index
    %c80 = arith.constant 80 : index
    %105 = vector.load %arg5[%c0_105, %c0_106, %c80] : memref<1x4x256xf32, #tpu.memory_space<vmem>>, vector<1x4x16xf32>
    %106 = vector.shape_cast %105 : vector<1x4x16xf32> to vector<4x16xf32>
    %107 = vector.shape_cast %104 : vector<4x16xf32> to vector<1x4x16xf32>
    tpu.vector_store %arg5[%c0_105, %c0_106, %c80], %107 {strides = array<i32>} : memref<1x4x256xf32, #tpu.memory_space<vmem>>, vector<1x4x16xf32>,
    %c0_107 = arith.constant 0 : index
    %c90_108 = arith.constant 90 : index
    %108 = vector.load %arg8[%c0_107, %c90_108] : memref<2x286xf32, #tpu.memory_space<vmem>>, vector<2x16xf32>
    %c0_109 = arith.constant 0 : index
    %c0_110 = arith.constant 0 : index
    %c80_111 = arith.constant 80 : index
    %109 = vector.load %arg6[%c0_109, %c0_110, %c80_111] : memref<1x2x256xf32, #tpu.memory_space<vmem>>, vector<1x2x16xf32>
    %110 = vector.shape_cast %109 : vector<1x2x16xf32> to vector<2x16xf32>
    %111 = vector.shape_cast %108 : vector<2x16xf32> to vector<1x2x16xf32>
    tpu.vector_store %arg6[%c0_109, %c0_110, %c80_111], %111 {strides = array<i32>} : memref<1x2x256xf32, #tpu.memory_space<vmem>>, vector<1x2x16xf32>,
    %c0_112 = arith.constant 0 : index
    %c108 = arith.constant 108 : index
    %112 = vector.load %arg7[%c0_112, %c108] : memref<4x286xf32, #tpu.memory_space<vmem>>, vector<4x16xf32>
    %c0_113 = arith.constant 0 : index
    %c0_114 = arith.constant 0 : index
    %c96 = arith.constant 96 : index
    %113 = vector.load %arg5[%c0_113, %c0_114, %c96] : memref<1x4x256xf32, #tpu.memory_space<vmem>>, vector<1x4x16xf32>
    %114 = vector.shape_cast %113 : vector<1x4x16xf32> to vector<4x16xf32>
    %115 = vector.shape_cast %112 : vector<4x16xf32> to vector<1x4x16xf32>
    tpu.vector_store %arg5[%c0_113, %c0_114, %c96], %115 {strides = array<i32>} : memref<1x4x256xf32, #tpu.memory_space<vmem>>, vector<1x4x16xf32>,
    %c0_115 = arith.constant 0 : index
    %c108_116 = arith.constant 108 : index
    %116 = vector.load %arg8[%c0_115, %c108_116] : memref<2x286xf32, #tpu.memory_space<vmem>>, vector<2x16xf32>
    %c0_117 = arith.constant 0 : index
    %c0_118 = arith.constant 0 : index
    %c96_119 = arith.constant 96 : index
    %117 = vector.load %arg6[%c0_117, %c0_118, %c96_119] : memref<1x2x256xf32, #tpu.memory_space<vmem>>, vector<1x2x16xf32>
    %118 = vector.shape_cast %117 : vector<1x2x16xf32> to vector<2x16xf32>
    %119 = vector.shape_cast %116 : vector<2x16xf32> to vector<1x2x16xf32>
    tpu.vector_store %arg6[%c0_117, %c0_118, %c96_119], %119 {strides = array<i32>} : memref<1x2x256xf32, #tpu.memory_space<vmem>>, vector<1x2x16xf32>,
    %c0_120 = arith.constant 0 : index
    %c126 = arith.constant 126 : index
    %120 = vector.load %arg7[%c0_120, %c126] : memref<4x286xf32, #tpu.memory_space<vmem>>, vector<4x16xf32>
    %c0_121 = arith.constant 0 : index
    %c0_122 = arith.constant 0 : index
    %c112 = arith.constant 112 : index
    %121 = vector.load %arg5[%c0_121, %c0_122, %c112] : memref<1x4x256xf32, #tpu.memory_space<vmem>>, vector<1x4x16xf32>
    %122 = vector.shape_cast %121 : vector<1x4x16xf32> to vector<4x16xf32>
    %123 = vector.shape_cast %120 : vector<4x16xf32> to vector<1x4x16xf32>
    tpu.vector_store %arg5[%c0_121, %c0_122, %c112], %123 {strides = array<i32>} : memref<1x4x256xf32, #tpu.memory_space<vmem>>, vector<1x4x16xf32>,
    %c0_123 = arith.constant 0 : index
    %c126_124 = arith.constant 126 : index
    %124 = vector.load %arg8[%c0_123, %c126_124] : memref<2x286xf32, #tpu.memory_space<vmem>>, vector<2x16xf32>
    %c0_125 = arith.constant 0 : index
    %c0_126 = arith.constant 0 : index
    %c112_127 = arith.constant 112 : index
    %125 = vector.load %arg6[%c0_125, %c0_126, %c112_127] : memref<1x2x256xf32, #tpu.memory_space<vmem>>, vector<1x2x16xf32>
    %126 = vector.shape_cast %125 : vector<1x2x16xf32> to vector<2x16xf32>
    %127 = vector.shape_cast %124 : vector<2x16xf32> to vector<1x2x16xf32>
    tpu.vector_store %arg6[%c0_125, %c0_126, %c112_127], %127 {strides = array<i32>} : memref<1x2x256xf32, #tpu.memory_space<vmem>>, vector<1x2x16xf32>,
    %c0_128 = arith.constant 0 : index
    %c144 = arith.constant 144 : index
    %128 = vector.load %arg7[%c0_128, %c144] : memref<4x286xf32, #tpu.memory_space<vmem>>, vector<4x16xf32>
    %c0_129 = arith.constant 0 : index
    %c0_130 = arith.constant 0 : index
    %c128 = arith.constant 128 : index
    %129 = vector.load %arg5[%c0_129, %c0_130, %c128] : memref<1x4x256xf32, #tpu.memory_space<vmem>>, vector<1x4x16xf32>
    %130 = vector.shape_cast %129 : vector<1x4x16xf32> to vector<4x16xf32>
    %131 = vector.shape_cast %128 : vector<4x16xf32> to vector<1x4x16xf32>
    tpu.vector_store %arg5[%c0_129, %c0_130, %c128], %131 {strides = array<i32>} : memref<1x4x256xf32, #tpu.memory_space<vmem>>, vector<1x4x16xf32>,
    %c0_131 = arith.constant 0 : index
    %c144_132 = arith.constant 144 : index
    %132 = vector.load %arg8[%c0_131, %c144_132] : memref<2x286xf32, #tpu.memory_space<vmem>>, vector<2x16xf32>
    %c0_133 = arith.constant 0 : index
    %c0_134 = arith.constant 0 : index
    %c128_135 = arith.constant 128 : index
    %133 = vector.load %arg6[%c0_133, %c0_134, %c128_135] : memref<1x2x256xf32, #tpu.memory_space<vmem>>, vector<1x2x16xf32>
    %134 = vector.shape_cast %133 : vector<1x2x16xf32> to vector<2x16xf32>
    %135 = vector.shape_cast %132 : vector<2x16xf32> to vector<1x2x16xf32>
    tpu.vector_store %arg6[%c0_133, %c0_134, %c128_135], %135 {strides = array<i32>} : memref<1x2x256xf32, #tpu.memory_space<vmem>>, vector<1x2x16xf32>,
    %c0_136 = arith.constant 0 : index
    %c162 = arith.constant 162 : index
    %136 = vector.load %arg7[%c0_136, %c162] : memref<4x286xf32, #tpu.memory_space<vmem>>, vector<4x16xf32>
    %c0_137 = arith.constant 0 : index
    %c0_138 = arith.constant 0 : index
    %c144_139 = arith.constant 144 : index
    %137 = vector.load %arg5[%c0_137, %c0_138, %c144_139] : memref<1x4x256xf32, #tpu.memory_space<vmem>>, vector<1x4x16xf32>
    %138 = vector.shape_cast %137 : vector<1x4x16xf32> to vector<4x16xf32>
    %139 = vector.shape_cast %136 : vector<4x16xf32> to vector<1x4x16xf32>
    tpu.vector_store %arg5[%c0_137, %c0_138, %c144_139], %139 {strides = array<i32>} : memref<1x4x256xf32, #tpu.memory_space<vmem>>, vector<1x4x16xf32>,
    %c0_140 = arith.constant 0 : index
    %c162_141 = arith.constant 162 : index
    %140 = vector.load %arg8[%c0_140, %c162_141] : memref<2x286xf32, #tpu.memory_space<vmem>>, vector<2x16xf32>
    %c0_142 = arith.constant 0 : index
    %c0_143 = arith.constant 0 : index
    %c144_144 = arith.constant 144 : index
    %141 = vector.load %arg6[%c0_142, %c0_143, %c144_144] : memref<1x2x256xf32, #tpu.memory_space<vmem>>, vector<1x2x16xf32>
    %142 = vector.shape_cast %141 : vector<1x2x16xf32> to vector<2x16xf32>
    %143 = vector.shape_cast %140 : vector<2x16xf32> to vector<1x2x16xf32>
    tpu.vector_store %arg6[%c0_142, %c0_143, %c144_144], %143 {strides = array<i32>} : memref<1x2x256xf32, #tpu.memory_space<vmem>>, vector<1x2x16xf32>,
    %c0_145 = arith.constant 0 : index
    %c180 = arith.constant 180 : index
    %144 = vector.load %arg7[%c0_145, %c180] : memref<4x286xf32, #tpu.memory_space<vmem>>, vector<4x16xf32>
    %c0_146 = arith.constant 0 : index
    %c0_147 = arith.constant 0 : index
    %c160 = arith.constant 160 : index
    %145 = vector.load %arg5[%c0_146, %c0_147, %c160] : memref<1x4x256xf32, #tpu.memory_space<vmem>>, vector<1x4x16xf32>
    %146 = vector.shape_cast %145 : vector<1x4x16xf32> to vector<4x16xf32>
    %147 = vector.shape_cast %144 : vector<4x16xf32> to vector<1x4x16xf32>
    tpu.vector_store %arg5[%c0_146, %c0_147, %c160], %147 {strides = array<i32>} : memref<1x4x256xf32, #tpu.memory_space<vmem>>, vector<1x4x16xf32>,
    %c0_148 = arith.constant 0 : index
    %c180_149 = arith.constant 180 : index
    %148 = vector.load %arg8[%c0_148, %c180_149] : memref<2x286xf32, #tpu.memory_space<vmem>>, vector<2x16xf32>
    %c0_150 = arith.constant 0 : index
    %c0_151 = arith.constant 0 : index
    %c160_152 = arith.constant 160 : index
    %149 = vector.load %arg6[%c0_150, %c0_151, %c160_152] : memref<1x2x256xf32, #tpu.memory_space<vmem>>, vector<1x2x16xf32>
    %150 = vector.shape_cast %149 : vector<1x2x16xf32> to vector<2x16xf32>
    %151 = vector.shape_cast %148 : vector<2x16xf32> to vector<1x2x16xf32>
    tpu.vector_store %arg6[%c0_150, %c0_151, %c160_152], %151 {strides = array<i32>} : memref<1x2x256xf32, #tpu.memory_space<vmem>>, vector<1x2x16xf32>,
    %c0_153 = arith.constant 0 : index
    %c198 = arith.constant 198 : index
    %152 = vector.load %arg7[%c0_153, %c198] : memref<4x286xf32, #tpu.memory_space<vmem>>, vector<4x16xf32>
    %c0_154 = arith.constant 0 : index
    %c0_155 = arith.constant 0 : index
    %c176 = arith.constant 176 : index
    %153 = vector.load %arg5[%c0_154, %c0_155, %c176] : memref<1x4x256xf32, #tpu.memory_space<vmem>>, vector<1x4x16xf32>
    %154 = vector.shape_cast %153 : vector<1x4x16xf32> to vector<4x16xf32>
    %155 = vector.shape_cast %152 : vector<4x16xf32> to vector<1x4x16xf32>
    tpu.vector_store %arg5[%c0_154, %c0_155, %c176], %155 {strides = array<i32>} : memref<1x4x256xf32, #tpu.memory_space<vmem>>, vector<1x4x16xf32>,
    %c0_156 = arith.constant 0 : index
    %c198_157 = arith.constant 198 : index
    %156 = vector.load %arg8[%c0_156, %c198_157] : memref<2x286xf32, #tpu.memory_space<vmem>>, vector<2x16xf32>
    %c0_158 = arith.constant 0 : index
    %c0_159 = arith.constant 0 : index
    %c176_160 = arith.constant 176 : index
    %157 = vector.load %arg6[%c0_158, %c0_159, %c176_160] : memref<1x2x256xf32, #tpu.memory_space<vmem>>, vector<1x2x16xf32>
    %158 = vector.shape_cast %157 : vector<1x2x16xf32> to vector<2x16xf32>
    %159 = vector.shape_cast %156 : vector<2x16xf32> to vector<1x2x16xf32>
    tpu.vector_store %arg6[%c0_158, %c0_159, %c176_160], %159 {strides = array<i32>} : memref<1x2x256xf32, #tpu.memory_space<vmem>>, vector<1x2x16xf32>,
    %c0_161 = arith.constant 0 : index
    %c216 = arith.constant 216 : index
    %160 = vector.load %arg7[%c0_161, %c216] : memref<4x286xf32, #tpu.memory_space<vmem>>, vector<4x16xf32>
    %c0_162 = arith.constant 0 : index
    %c0_163 = arith.constant 0 : index
    %c192 = arith.constant 192 : index
    %161 = vector.load %arg5[%c0_162, %c0_163, %c192] : memref<1x4x256xf32, #tpu.memory_space<vmem>>, vector<1x4x16xf32>
    %162 = vector.shape_cast %161 : vector<1x4x16xf32> to vector<4x16xf32>
    %163 = vector.shape_cast %160 : vector<4x16xf32> to vector<1x4x16xf32>
    tpu.vector_store %arg5[%c0_162, %c0_163, %c192], %163 {strides = array<i32>} : memref<1x4x256xf32, #tpu.memory_space<vmem>>, vector<1x4x16xf32>,
    %c0_164 = arith.constant 0 : index
    %c216_165 = arith.constant 216 : index
    %164 = vector.load %arg8[%c0_164, %c216_165] : memref<2x286xf32, #tpu.memory_space<vmem>>, vector<2x16xf32>
    %c0_166 = arith.constant 0 : index
    %c0_167 = arith.constant 0 : index
    %c192_168 = arith.constant 192 : index
    %165 = vector.load %arg6[%c0_166, %c0_167, %c192_168] : memref<1x2x256xf32, #tpu.memory_space<vmem>>, vector<1x2x16xf32>
    %166 = vector.shape_cast %165 : vector<1x2x16xf32> to vector<2x16xf32>
    %167 = vector.shape_cast %164 : vector<2x16xf32> to vector<1x2x16xf32>
    tpu.vector_store %arg6[%c0_166, %c0_167, %c192_168], %167 {strides = array<i32>} : memref<1x2x256xf32, #tpu.memory_space<vmem>>, vector<1x2x16xf32>,
    %c0_169 = arith.constant 0 : index
    %c234 = arith.constant 234 : index
    %168 = vector.load %arg7[%c0_169, %c234] : memref<4x286xf32, #tpu.memory_space<vmem>>, vector<4x16xf32>
    %c0_170 = arith.constant 0 : index
    %c0_171 = arith.constant 0 : index
    %c208 = arith.constant 208 : index
    %169 = vector.load %arg5[%c0_170, %c0_171, %c208] : memref<1x4x256xf32, #tpu.memory_space<vmem>>, vector<1x4x16xf32>
    %170 = vector.shape_cast %169 : vector<1x4x16xf32> to vector<4x16xf32>
    %171 = vector.shape_cast %168 : vector<4x16xf32> to vector<1x4x16xf32>
    tpu.vector_store %arg5[%c0_170, %c0_171, %c208], %171 {strides = array<i32>} : memref<1x4x256xf32, #tpu.memory_space<vmem>>, vector<1x4x16xf32>,
    %c0_172 = arith.constant 0 : index
    %c234_173 = arith.constant 234 : index
    %172 = vector.load %arg8[%c0_172, %c234_173] : memref<2x286xf32, #tpu.memory_space<vmem>>, vector<2x16xf32>
    %c0_174 = arith.constant 0 : index
    %c0_175 = arith.constant 0 : index
    %c208_176 = arith.constant 208 : index
    %173 = vector.load %arg6[%c0_174, %c0_175, %c208_176] : memref<1x2x256xf32, #tpu.memory_space<vmem>>, vector<1x2x16xf32>
    %174 = vector.shape_cast %173 : vector<1x2x16xf32> to vector<2x16xf32>
    %175 = vector.shape_cast %172 : vector<2x16xf32> to vector<1x2x16xf32>
    tpu.vector_store %arg6[%c0_174, %c0_175, %c208_176], %175 {strides = array<i32>} : memref<1x2x256xf32, #tpu.memory_space<vmem>>, vector<1x2x16xf32>,
    %c0_177 = arith.constant 0 : index
    %c252 = arith.constant 252 : index
    %176 = vector.load %arg7[%c0_177, %c252] : memref<4x286xf32, #tpu.memory_space<vmem>>, vector<4x16xf32>
    %c0_178 = arith.constant 0 : index
    %c0_179 = arith.constant 0 : index
    %c224 = arith.constant 224 : index
    %177 = vector.load %arg5[%c0_178, %c0_179, %c224] : memref<1x4x256xf32, #tpu.memory_space<vmem>>, vector<1x4x16xf32>
    %178 = vector.shape_cast %177 : vector<1x4x16xf32> to vector<4x16xf32>
    %179 = vector.shape_cast %176 : vector<4x16xf32> to vector<1x4x16xf32>
    tpu.vector_store %arg5[%c0_178, %c0_179, %c224], %179 {strides = array<i32>} : memref<1x4x256xf32, #tpu.memory_space<vmem>>, vector<1x4x16xf32>,
    %c0_180 = arith.constant 0 : index
    %c252_181 = arith.constant 252 : index
    %180 = vector.load %arg8[%c0_180, %c252_181] : memref<2x286xf32, #tpu.memory_space<vmem>>, vector<2x16xf32>
    %c0_182 = arith.constant 0 : index
    %c0_183 = arith.constant 0 : index
    %c224_184 = arith.constant 224 : index
    %181 = vector.load %arg6[%c0_182, %c0_183, %c224_184] : memref<1x2x256xf32, #tpu.memory_space<vmem>>, vector<1x2x16xf32>
    %182 = vector.shape_cast %181 : vector<1x2x16xf32> to vector<2x16xf32>
    %183 = vector.shape_cast %180 : vector<2x16xf32> to vector<1x2x16xf32>
    tpu.vector_store %arg6[%c0_182, %c0_183, %c224_184], %183 {strides = array<i32>} : memref<1x2x256xf32, #tpu.memory_space<vmem>>, vector<1x2x16xf32>,
    %c0_185 = arith.constant 0 : index
    %c270 = arith.constant 270 : index
    %184 = vector.load %arg7[%c0_185, %c270] : memref<4x286xf32, #tpu.memory_space<vmem>>, vector<4x16xf32>
    %c0_186 = arith.constant 0 : index
    %c0_187 = arith.constant 0 : index
    %c240 = arith.constant 240 : index
    %185 = vector.load %arg5[%c0_186, %c0_187, %c240] : memref<1x4x256xf32, #tpu.memory_space<vmem>>, vector<1x4x16xf32>
    %186 = vector.shape_cast %185 : vector<1x4x16xf32> to vector<4x16xf32>
    %187 = vector.shape_cast %184 : vector<4x16xf32> to vector<1x4x16xf32>
    tpu.vector_store %arg5[%c0_186, %c0_187, %c240], %187 {strides = array<i32>} : memref<1x4x256xf32, #tpu.memory_space<vmem>>, vector<1x4x16xf32>,
    %c0_188 = arith.constant 0 : index
    %c270_189 = arith.constant 270 : index
    %188 = vector.load %arg8[%c0_188, %c270_189] : memref<2x286xf32, #tpu.memory_space<vmem>>, vector<2x16xf32>
    %c0_190 = arith.constant 0 : index
    %c0_191 = arith.constant 0 : index
    %c240_192 = arith.constant 240 : index
    %189 = vector.load %arg6[%c0_190, %c0_191, %c240_192] : memref<1x2x256xf32, #tpu.memory_space<vmem>>, vector<1x2x16xf32>
    %190 = vector.shape_cast %189 : vector<1x2x16xf32> to vector<2x16xf32>
    %191 = vector.shape_cast %188 : vector<2x16xf32> to vector<1x2x16xf32>
    tpu.vector_store %arg6[%c0_190, %c0_191, %c240_192], %191 {strides = array<i32>} : memref<1x2x256xf32, #tpu.memory_space<vmem>>, vector<1x2x16xf32>,
    return
  }
  func.func @transform_0(%arg0: i32) -> (i32, i32, i32) {
    %c0_i32 = arith.constant 0 : i32
    %c0_i32_0 = arith.constant 0 : i32
    %c0_i32_1 = arith.constant 0 : i32
    return %arg0, %c0_i32, %c0_i32_0 : i32, i32, i32
  }
  func.func @transform_1(%arg0: i32) -> (i32, i32, i32) {
    %c0_i32 = arith.constant 0 : i32
    %c0_i32_0 = arith.constant 0 : i32
    %c0_i32_1 = arith.constant 0 : i32
    %c0_i32_2 = arith.constant 0 : i32
    return %c0_i32, %c0_i32_0, %c0_i32_1 : i32, i32, i32
  }
  func.func @transform_2(%arg0: i32) -> (i32, i32) {
    %c0_i32 = arith.constant 0 : i32
    %c0_i32_0 = arith.constant 0 : i32
    %c0_i32_1 = arith.constant 0 : i32
    return %c0_i32, %c0_i32_0 : i32, i32
  }
  func.func @transform_3(%arg0: i32) -> (i32, i32) {
    %c0_i32 = arith.constant 0 : i32
    %c0_i32_0 = arith.constant 0 : i32
    %c0_i32_1 = arith.constant 0 : i32
    return %c0_i32, %c0_i32_0 : i32, i32
  }
  func.func @transform_4(%arg0: i32) -> (i32, i32, i32) {
    %c0_i32 = arith.constant 0 : i32
    %c0_i32_0 = arith.constant 0 : i32
    %c0_i32_1 = arith.constant 0 : i32
    return %arg0, %c0_i32, %c0_i32_0 : i32, i32, i32
  }
  func.func @transform_5(%arg0: i32) -> (i32, i32, i32) {
    %c0_i32 = arith.constant 0 : i32
    %c0_i32_0 = arith.constant 0 : i32
    %c0_i32_1 = arith.constant 0 : i32
    return %arg0, %c0_i32, %c0_i32_0 : i32, i32, i32
  }
}

</mosaic_0001>

<bundles_post_ra>
// kernel: tpu_custom_call.1
= control target key start
LH: loop header
LB: loop body
LE: loop exit
PB: predicated region body
PF: predicated region fallthrough
CT: control target
= control target key end

     0   :  { %11 = vsyncpa [#allocation5], 0  ;;  %s3022_s0 = inlined_call_operand.vmem [shape: f32[2,4,324], index: 0, kind: input, shape index: {}]   ;;  %s3023_s1 = inlined_call_operand.vmem [shape: f32[9,4,4], index: 1, kind: input, shape index: {}]   ;;  %s3024_s2 = inlined_call_operand.vmem [shape: f32[4,1], index: 2, kind: input, shape index: {}]   ;;  %s3025_s3 = inlined_call_operand.vmem [shape: f32[2,4], index: 3, kind: input, shape index: {}]   ;;  %s3026_s4 = inlined_call_operand.hbm [shape: f32[2,4,256], index: 4, kind: output, shape index: {0}]   ;;  %s3027_s5 = inlined_call_operand.hbm [shape: f32[2,2,256], index: 5, kind: output, shape index: {1}]  }
   0x1   :  { %13 = vsyncpa [#allocation5 + $0x1], 0 }
   0x2   :  { %14 = vsyncpa [#allocation7], 0 }
   0x3   :  { %16 = vsyncpa [#allocation7 + $0x1], 0  ;;  %s2645_s18 = smov 0   ;;  %s2647_s19 = smov 0  }
   0x4   :  { %s2649_s20 = smov 0   ;;  %s2651_s21 = smov 0  }
   0x5 LB: > { %s2666_s22 = sadd.s32 4294967295, %s2587_s21   ;;  %s2261_s23 = sadd.s32 4294967294, %s2587_s21   ;;  %s2587_s21 = sphi %s2651_s21, %s3033_s21   ;;  %s2583_s20 = sphi %s2649_s20, %s3032_s20   ;;  %s2579_s19 = sphi %s2647_s19, %s3031_s19   ;;  %s2575_s18 = sphi %s2645_s18, %s3030_s18  }
   0x6   : > { %s2670_s24 = sadd.s32 1, %s2587_s21   ;;  %s118_s25 = sadd.s32 1, %s2583_s20 }
   0x7   : > { %s115_s26 = ssub.s32 %s2587_s21, %s2670_s24  ;;  %p128_p0 = scmp.ne.s32.totalorder %s2583_s20, %s2579_s19 }
   0x8   : > { %p116_p1 = scmp.eq.s32.totalorder %s115_s26, 0  ;;  %p129_p2 = scmp.eq.s32.totalorder %s2666_s22, 1 }
   0x9   : > { %p134_p3 = scmp.ne.s32.totalorder %s2579_s19, %s2575_s18  ;;  %p135_p4 = scmp.eq.s32.totalorder %s2261_s23, 1 }
   0xa   : > { %s2681_s27 = scalar_select %p116_p1, %s2583_s20, %s118_s25  }
   0xb   : > { %p2683_p5 = por %p129_p2, %p128_p0  ;;  %p2687_p6 = por %p135_p4, %p134_p3 }
   0xc   : > { %p2264_p7 = scmp.ge.s32.totalorder %s2587_s21, 1  ;;  %p196_p8 = scmp.lt.s32.totalorder %s2587_s21, 3 }
   0xe   : > { %p197_p9 = pnand %p2264_p7, %p196_p8 }
   0xf   : > { %p229_p10 = scmp.lt.s32.totalorder (!%p197_p9), %s2666_s22, 1  ;;  %v2589_v0 = vmov (!%p197_p9), 0.0   ;;  %vm2590_vm0 = vmmov (!%p197_p9), 0   ;;  %s2591_s10 = smov (!%p197_p9), 127   ;;  %v1736_v11 = vld [vmem:[%s3024_s2] sm:$0xf] (!%p197_p9) }
  0x10   : > { %200 = sbr.rel (%p197_p9) target bundleno = 648 (0x288), region = 36  ;;  %2356 = vmatprep.subr.mxu1 (!%p197_p9), %v2589_v0  ;;  %326 = vmatprep.mubr.f32.mxu0 (!%p197_p9), %v2589_v0  ;;  %s2592_s11 = smov (!%p197_p9), 126   ;;  %v2599_v12 = vmov (!%p197_p9), 0   ;;  %vm255_vm1 = vcmask (!%p197_p9), 1043456   ;;  %vm248_vm2 = vcmask (!%p197_p9), 1039360   ;;  %vm251_vm3 = vcmask (!%p197_p9), 31744  }
  0x11   : > { %2358 = vmatprep.mubr.msk.f32.mxu1 (!%p197_p9), %vm2590_vm0, %v2589_v0  ;;  %s2593_s12 = smov (!%p197_p9), 110   ;;  %s2594_s13 = smov (!%p197_p9), 109   ;;  %2491 = vset.pattern.permute.xlu0 (!%p197_p9), %v2599_v12  ;;  %v2268_v18 = vld [vmem:[%s3023_s1 + $0x4] sm:$0xf] (!%p197_p9)  ;;  %vm566_vm4 = vcmask (!%p197_p9), 1031168   ;;  %vm735_vm5 = vcmask (!%p197_p9), 900096  }
  0x12   : > { %s2595_s14 = smov (!%p197_p9), 108   ;;  %s2596_s15 = smov (!%p197_p9), 92   ;;  %v236_v24 = vld [vmem:[%s3023_s1] sm:$0xf] (!%p197_p9)  ;;  %v2279_v26 = vld [vmem:[%s3023_s1 + $0x8] sm:$0xf] (!%p197_p9) }
  0x13   : > { %s2597_s16 = smov (!%p197_p9), 91   ;;  %s2598_s17 = smov (!%p197_p9), 90   ;;  %v2285_v31 = vld [vmem:[%s3023_s1 + $0xc] sm:$0xf] (!%p197_p9)  ;;  %vm904_vm6 = vcmask (!%p197_p9), 891904   ;;  %vm1073_vm7 = vcmask (!%p197_p9), 883712  }
  0x14   : > { %v2291_v34 = vld [vmem:[%s3023_s1 + $0x10] sm:$0xf] (!%p197_p9)  ;;  %v2297_v39 = vld [vmem:[%s3023_s1 + $0x14] sm:$0xf] (!%p197_p9)  ;;  %v2303_v46 = vld [vmem:[%s3023_s1 + $0x18] sm:$0xf] (!%p197_p9) }
  0x15   : > { %vm1242_vm8 = vcmask (!%p197_p9), 752640   ;;  %v2309_v49 = vld [vmem:[%s3023_s1 + $0x1c] sm:$0xf] (!%p197_p9)  ;;  %v2315_v53 = vld [vmem:[%s3023_s1 + $0x20] sm:$0xf] (!%p197_p9)  ;;  %vm1411_vm9 = vcmask (!%p197_p9), 744448  }
  0x16   : > { %v1745_v57 = vld [vmem:[%s3025_s3] sm:$0x3] (!%p197_p9)  ;;  %vm1580_vm10 = vcmask (!%p197_p9), 736256   ;;  %vm1898_vm11 = vcmask (!%p197_p9), 240640   ;;  %vm1920_vm12 = vcmask (!%p197_p9), 1041408   ;;  %vm1921_vm13 = vcmask (!%p197_p9), 1043458  }
  0x17   : > { %s230_s30 = scalar_select %p229_p10, %s2666_s22, 1  ;;  %vm1922_vm14 = vmor %vm1921_vm13, %vm1920_vm12  ;;  %vm1923_vm15 = vcmask 242692   ;;  %vm2112_vm12 = vcmask 818176   ;;  %vm2007_vm13 = vcmask 913152  }
  0x18   : > { %s2602_s25 = smov 124   ;;  %s2606_s7 = smov 120  }
  0x19   : > { %s2422_s6 = smul.u32 12, %s230_s30  ;;  %s2603_s30 = smov 122  }
  0x1a   : > { %s2608_s8 = smov 104  }
  0x1b   : > { %s2700_s9 = scalar_lea.vmem %s3022_s0, %s2422_s6  ;;  %s2604_s6 = smov 106  }
  0x1c   : > { %v2705_v1 = vld [vmem:[%s2700_s9] sm:$0xff]  ;;  %v2711_v3 = vld [vmem:[%s2700_s9 + $0x8] sm:$0xf] }
  0x1d   : > { %242 = vrot.lane.b32.xlu1 %v2705_v1, %s2591_s10  ;;  %v241_v2 = vcombine.high %v2705_v1, %v2705_v1  ;;  %v554_v4 = vld [vmem:[%s2700_s9 + $0x8] sm:$0xf] }
  0x1e   : > { %v723_v5 = vld [vmem:[%s2700_s9 + $0x8] sm:$0xf] }
  0x1f   : > { %244 = vrot.lane.b32.xlu0 %v241_v2, %s2591_s10  ;;  %v892_v6 = vld [vmem:[%s2700_s9 + $0x8] sm:$0xf] }
  0x20   : > { %v1061_v7 = vld [vmem:[%s2700_s9 + $0x8] sm:$0xf] }
  0x21   : > { %562 = vrot.lane.b32.xlu1 %v241_v2, %s2592_s11  ;;  %v1230_v8 = vld [vmem:[%s2700_s9 + $0x8] sm:$0xf] }
  0x22   : > { %v1399_v9 = vld [vmem:[%s2700_s9 + $0x8] sm:$0xf] }
  0x23   : > { %246 = vrot.lane.b32.xlu0 %v2711_v3, %s2591_s10  ;;  %v1568_v10 = vld [vmem:[%s2700_s9 + $0x8] sm:$0xf]  ;;  %s2610_s9 = smov 102   ;;  %s2611_s10 = smov 116  }
  0x25   : > { %560 = vrot.lane.b32.xlu1 %v2705_v1, %s2592_s11 }
  0x27   : > { %564 = vrot.lane.b32.xlu0 %v554_v4, %s2592_s11 }
  0x29   : > { %733 = vrot.lane.b32.xlu1 %v723_v5, %s2593_s12 }
  0x2b   : > { %731 = vrot.lane.b32.xlu0 %v241_v2, %s2593_s12 }
  0x2d   : > { %900 = vrot.lane.b32.xlu1 %v241_v2, %s2594_s13 }
  0x2f   : > { %729 = vrot.lane.b32.xlu0 %v2705_v1, %s2593_s12 }
  0x31   : > { %898 = vrot.lane.b32.xlu1 %v2705_v1, %s2594_s13 }
  0x33   : > { %902 = vrot.lane.b32.xlu0 %v892_v6, %s2594_s13  ;;  %s2878_s13 = sand.u32 1, %s2579_s19  }
  0x34   : > { %s2266_s23 = sshll.u32 %s2878_s13, 2 }
  0x35   : > { %1071 = vrot.lane.b32.xlu1 %v1061_v7, %s2595_s14  ;;  %s2890_s26 = scalar_lea.vmem [#allocation6], %s2266_s23 }
  0x37   : > { %1069 = vrot.lane.b32.xlu0 %v241_v2, %s2595_s14 }
  0x39   : > { %1238 = vrot.lane.b32.xlu1 %v241_v2, %s2596_s15 }
  0x3b   : > { %1067 = vrot.lane.b32.xlu0 %v2705_v1, %s2595_s14 }
  0x3d   : > { %1236 = vrot.lane.b32.xlu1 %v2705_v1, %s2596_s15 }
  0x3f   : > { %1240 = vrot.lane.b32.xlu0 %v1230_v8, %s2596_s15  ;;  %s2265_s15 = sshll.u32 %s2878_s13, 3 }
  0x41   : > { %1409 = vrot.lane.b32.xlu1 %v1399_v9, %s2597_s16 }
  0x43   : > { %1407 = vrot.lane.b32.xlu0 %v241_v2, %s2597_s16 }
  0x45   : > { %1576 = vrot.lane.b32.xlu1 %v241_v2, %s2598_s17 }
  0x47   : > { %1405 = vrot.lane.b32.xlu0 %v2705_v1, %s2597_s16  ;;  %s2601_s16 = smov 112  }
  0x49   : > { %1574 = vrot.lane.b32.xlu1 %v2705_v1, %s2598_s17 }
  0x4b   : > { %1578 = vrot.lane.b32.xlu0 %v1568_v10, %s2598_s17  ;;  %s2883_s17 = scalar_lea.vmem [#allocation4], %s2265_s15  ;;  %s2612_s15 = smov 98  }
  0x4c   : > { %s2156_s23 = sshll.u32 %s2883_s17, 4  ;;  %s2936_s23 = int_to_ptr.vmem [resolvable:$true] %s2156_s23 }
  0x4f   : > { %1739 = vperm.xlu0 %2491, %v1736_v11  }
  0x8f   : > { %v243_v13 = vpop.permute.xlu1 %242 }
  0x91   : > { %v245_v14 = vpop.permute.xlu0 %244 }
  0x92   : > { %v249_v19 = vsel %vm248_vm2, %v243_v13, %v245_v14 }
  0x93   : > { %v563_v15 = vpop.permute.xlu1 %562 }
  0x95   : > { %v247_v16 = vpop.permute.xlu0 %246 }
  0x96   : > { %2357 = vmatpush3.msk.msra.mxu1 %vm255_vm1, %v247_v16  ;;  %v250_v17 = vsel %vm248_vm2, %v245_v14, %v247_v16  ;;  %vm1930_vm2 = vcmask 123904  }
  0x97   : > { %2269 = vmatprep.subr.msk.mxu0 %vm255_vm1, %v250_v17  ;;  %v561_v20 = vpop.permute.xlu1 %560  ;;  %2359 = vmatmul.mubr.msk.f32.vlgmr.msra.gmra.mrb[0].mxu1 %vm251_vm3, %v2268_v18 }
  0x98   : > { %2270 = vmatpush1.msk.msra.mxu0 %vm255_vm1, %v249_v19  ;;  %2361 = vmatprep.subr.mxu1 %v2589_v0  ;;  %v567_v27 = vsel %vm566_vm4, %v561_v20, %v563_v15 }
  0x99   : > { %2271 = vmatmul.mubr.msk.f32.vlgmr.msra.gmra.mrb[0].mxu0 %vm251_vm3, %v2268_v18  ;;  %2274 = vmatprep.subr.msk.mxu0 %vm255_vm1, %v241_v2  ;;  %v565_v21 = vpop.permute.xlu0 %564 }
  0x9a   : > { %v568_v22 = vsel %vm566_vm4, %v563_v15, %v565_v21  ;;  %2275 = vmatpush1.msk.msra.mxu0 %vm255_vm1, %v2705_v1  ;;  %2362 = vmatpush3.msk.msra.mxu1 %vm255_vm1, %v2711_v3  ;;  %vm1951_vm4 = vcmask 388352  }
  0x9b   : > { %2280 = vmatprep.subr.msk.mxu0 %vm255_vm1, %v568_v22  ;;  %2363 = vmatprep.mubr.msk.f32.mxu1 %vm2590_vm0, %v2589_v0  ;;  %v734_v23 = vpop.permute.xlu1 %733 }
  0x9c   : > { %2366 = vmatprep.subr.mxu1 %v2589_v0  ;;  %476 = vmatprep.mubr.f32.mxu0 %v2589_v0 }
  0x9d   : > { %v732_v25 = vpop.permute.xlu0 %731  ;;  %2364 = vmatmul.mubr.msk.f32.vlgmr.msra.gmra.mrb[2].mxu1 %vm251_vm3, %v236_v24 }
  0x9e   : > { %2367 = vmatpush3.msk.msra.mxu1 %vm255_vm1, %v565_v21  ;;  %2368 = vmatprep.mubr.msk.f32.mxu1 %vm2590_vm0, %v2589_v0  ;;  %v737_v29 = vsel %vm735_vm5, %v732_v25, %v734_v23 }
  0x9f   : > { %v901_v28 = vpop.permute.xlu1 %900  ;;  %2371 = vmatprep.subr.mxu1 %v2589_v0 }
  0xa1   : > { %2276 = vmatmul.mubr.msk.f32.vlgmr.msra.gmra.mrb[0].mxu0 %vm251_vm3, %v236_v24  ;;  %v730_v30 = vpop.permute.xlu0 %729  ;;  %2369 = vmatmul.mubr.msk.f32.vlgmr.msra.gmra.mrb[4].mxu1 %vm251_vm3, %v2279_v26 }
  0xa2   : > { %2281 = vmatpush1.msk.msra.mxu0 %vm255_vm1, %v567_v27  ;;  %642 = vmatprep.mubr.f32.mxu0 %v2589_v0  ;;  %v736_v35 = vsel %vm735_vm5, %v730_v30, %v732_v25  ;;  %vm1944_vm5 = vcmask 255104  }
  0xa3   : > { %2286 = vmatprep.subr.msk.mxu0 %vm255_vm1, %v737_v29  ;;  %2372 = vmatpush3.msk.msra.mxu1 %vm255_vm1, %v734_v23  ;;  %v899_v32 = vpop.permute.xlu1 %898  ;;  %v2600_v29 = vmov 1983009808  }
  0xa4   : > { %2373 = vmatprep.mubr.msk.f32.mxu1 %vm2590_vm0, %v2589_v0  ;;  %2376 = vmatprep.subr.mxu1 %v2589_v0  ;;  %v905_v42 = vsel %vm904_vm6, %v899_v32, %v901_v28  ;;  %v1905_v30 = vunpack.c.l.s4 %v2600_v29 }
  0xa5   : > { %v903_v33 = vpop.permute.xlu0 %902  ;;  %2374 = vmatmul.mubr.msk.f32.vlgmr.msra.gmra.mrb[6].mxu1 %vm251_vm3, %v2285_v31 }
  0xa6   : > { %2377 = vmatpush3.msk.msra.mxu1 %vm255_vm1, %v903_v33  ;;  %2378 = vmatprep.mubr.msk.f32.mxu1 %vm2590_vm0, %v2589_v0  ;;  %v2795_v37 = vsel %vm904_vm6, %v901_v28, %v903_v33  ;;  %vm1965_vm6 = vcmask 519552  }
  0xa7   : > { %v1072_v36 = vpop.permute.xlu1 %1071  ;;  %2381 = vmatprep.subr.mxu1 %v2589_v0 }
  0xa9   : > { %2282 = vmatmul.mubr.msk.f32.vlgmr.msra.gmra.mrb[0].mxu0 %vm251_vm3, %v2279_v26  ;;  %v1070_v38 = vpop.permute.xlu0 %1069  ;;  %2379 = vmatmul.mubr.msk.f32.vlgmr.msra.gmra.mrb[8].mxu1 %vm251_vm3, %v2291_v34 }
  0xaa   : > { %2287 = vmatpush1.msk.msra.mxu0 %vm255_vm1, %v736_v35  ;;  %811 = vmatprep.mubr.f32.mxu0 %v2589_v0  ;;  %v1075_v44 = vsel %vm1073_vm7, %v1070_v38, %v1072_v36 }
  0xab   : > { %2292 = vmatprep.subr.msk.mxu0 %vm255_vm1, %v2795_v37  ;;  %v1239_v40 = vpop.permute.xlu1 %1238  ;;  %2382 = vmatpush3.msk.msra.mxu1 %vm255_vm1, %v1072_v36 }
  0xac   : > { %2383 = vmatprep.mubr.msk.f32.mxu1 %vm2590_vm0, %v2589_v0  ;;  %2386 = vmatprep.subr.mxu1 %v2589_v0 }
  0xad   : > { %v1068_v41 = vpop.permute.xlu0 %1067  ;;  %2384 = vmatmul.mubr.msk.f32.vlgmr.msra.gmra.mrb[10].mxu1 %vm251_vm3, %v2297_v39 }
  0xae   : > { %2388 = vmatprep.mubr.msk.f32.mxu1 %vm2590_vm0, %v2589_v0  ;;  %v1074_v50 = vsel %vm1073_vm7, %v1068_v41, %v1070_v38  ;;  %vm1958_vm7 = vcmask 386304  }
  0xaf   : > { %v1237_v43 = vpop.permute.xlu1 %1236 }
  0xb0   : > { %v1243_v55 = vsel %vm1242_vm8, %v1237_v43, %v1239_v40 }
  0xb1   : > { %2288 = vmatmul.mubr.msk.f32.vlgmr.msra.gmra.mrb[0].mxu0 %vm251_vm3, %v2285_v31  ;;  %v1241_v45 = vpop.permute.xlu0 %1240  ;;  %v1907_v31 = vlaneseq }
  0xb2   : > { %2293 = vmatpush1.msk.msra.mxu0 %vm255_vm1, %v905_v42  ;;  %2387 = vmatpush3.msk.msra.mxu1 %vm255_vm1, %v1241_v45  ;;  %v1244_v51 = vsel %vm1242_vm8, %v1239_v40, %v1241_v45  ;;  %vm1972_vm8 = vcmask 517504  }
  0xb3   : > { %2298 = vmatprep.subr.msk.mxu0 %vm255_vm1, %v1075_v44  ;;  %980 = vmatprep.mubr.f32.mxu0 %v2589_v0  ;;  %v1410_v47 = vpop.permute.xlu1 %1409 }
  0xb4   : > { %2389 = vmatmul.mubr.msk.f32.vlgmr.msra.gmra.mrb[12].mxu1 %vm251_vm3, %v2303_v46  ;;  %2391 = vmatprep.subr.mxu1 %v2589_v0 }
  0xb5   : > { %v1408_v48 = vpop.permute.xlu0 %1407  ;;  %2392 = vmatpush3.msk.msra.mxu1 %vm255_vm1, %v1410_v47  ;;  %2393 = vmatprep.mubr.msk.f32.mxu1 %vm2590_vm0, %v2589_v0 }
  0xb6   : > { %2396 = vmatprep.subr.mxu1 %v2589_v0  ;;  %v1413_v56 = vsel %vm1411_vm9, %v1408_v48, %v1410_v47 }
  0xb7   : > { %v1577_v58 = vpop.permute.xlu1 %1576 }
  0xb8   : > { %2394 = vmatmul.mubr.msk.f32.vlgmr.msra.gmra.mrb[14].mxu1 %vm251_vm3, %v2309_v49 }
  0xb9   : > { %2294 = vmatmul.mubr.msk.f32.vlgmr.msra.gmra.mrb[0].mxu0 %vm251_vm3, %v2291_v34  ;;  %v1406_v52 = vpop.permute.xlu0 %1405  ;;  %2398 = vmatprep.mubr.msk.f32.mxu1 %vm2590_vm0, %v2589_v0  ;;  %v1908_v34 = vshrl.u32 %v1907_v31, 7 }
  0xba   : > { %2299 = vmatpush1.msk.msra.mxu0 %vm255_vm1, %v1074_v50  ;;  %1149 = vmatprep.mubr.f32.mxu0 %v2589_v0  ;;  %v1412_v59 = vsel %vm1411_vm9, %v1406_v52, %v1408_v48  ;;  %vm1979_vm9 = vcmask 650752  }
  0xbb   : > { %2304 = vmatprep.subr.msk.mxu0 %vm255_vm1, %v1244_v51  ;;  %v1575_v61 = vpop.permute.xlu1 %1574 }
  0xbc   : > { %v1581_v62 = vsel %vm1580_vm10, %v1575_v61, %v1577_v58 }
  0xbd   : > { %v1579_v54 = vpop.permute.xlu0 %1578 }
  0xbe   : > { %2397 = vmatpush3.msk.msra.mxu1 %vm255_vm1, %v1579_v54  ;;  %v1582_v60 = vsel %vm1580_vm10, %v1577_v58, %v1579_v54  ;;  %vm1986_vm10 = vcmask 648704  }
  0xbf   : > { %2401 = vmatprep.subr.mxu1 %v2589_v0  ;;  %2399 = vmatmul.mubr.msk.f32.vlgmr.msra.gmra.mrb[16].mxu1 %vm251_vm3, %v2315_v53 }
  0xc0   : > { %2402 = vmatpush3.msk.msra.mxu1 %vm255_vm1, %v903_v33  ;;  %2403 = vmatprep.mubr.msk.f32.mxu1 %vm2590_vm0, %v2589_v0  ;;  %v1906_v33 = vunpack.c.0.s8 %v1905_v30  ;;  %vm1924_vm0 = vmor %vm1923_vm15, %vm1922_vm14  ;;  %vm2021_vm14 = vcmask 932864   ;;  %vm2024_vm15 = vcmask 1044352  }
  0xc1   : > { %2300 = vmatmul.mubr.msk.f32.vlgmr.msra.gmra.mrb[0].mxu0 %vm251_vm3, %v2297_v39 }
  0xc2   : > { %2305 = vmatpush1.msk.msra.mxu0 %vm255_vm1, %v1243_v55  ;;  %1318 = vmatprep.mubr.f32.mxu0 %v2589_v0  ;;  %v1909_v40 = vsub.s32 %v1906_v33, %v1908_v34 }
  0xc3   : > { %2310 = vmatprep.subr.msk.mxu0 %vm255_vm1, %v1413_v56  ;;  %2404 = vmatmul.mubr.msk.f32.vlgmr.msra.gmra.mrb[18].mxu1 %vm251_vm3, %v1745_v57 }
  0xc9   : > { %2306 = vmatmul.mubr.msk.f32.vlgmr.msra.gmra.mrb[0].mxu0 %vm251_vm3, %v2303_v46 }
  0xca   : > { %2311 = vmatpush1.msk.msra.mxu0 %vm255_vm1, %v1412_v59  ;;  %1487 = vmatprep.mubr.f32.mxu0 %v2589_v0 }
  0xcb   : > { %2316 = vmatprep.subr.msk.mxu0 %vm255_vm1, %v1582_v60 }
  0xce   : > { %v1740_v23 = vpop.permute.xlu0 %1739 }
  0xd1   : > { %2312 = vmatmul.mubr.msk.f32.vlgmr.msra.gmra.mrb[0].mxu0 %vm251_vm3, %v2309_v49 }
  0xd2   : > { %2317 = vmatpush1.msk.msra.mxu0 %vm255_vm1, %v1581_v62  ;;  %1656 = vmatprep.mubr.f32.mxu0 %v2589_v0 }
  0xd3   : > { %2321 = vmatprep.subr.msk.mxu0 %vm255_vm1, %v2795_v37 }
  0xd9   : > { %2318 = vmatmul.mubr.msk.f32.vlgmr.msra.gmra.mrb[0].mxu0 %vm251_vm3, %v2315_v53 }
  0xda   : > { %2322 = vmatpush1.msk.msra.mxu0 %vm255_vm1, %v905_v42  ;;  %1813 = vmatprep.mubr.f32.mxu0 %v2589_v0  ;;  %vm1927_vm1 = vcmask 125952  }
  0xdd   : > { %2323 = vmatmul.mubr.msk.f32.vlgmr.msra.gmra.mrb[2].mxu0 %vm251_vm3, %v1745_v57  ;;  %vm1937_vm3 = vcmask 257152  }
 0x16a   : > { %v399_v63 = vpop.f32.mrb[0].mxu1 }
 0x16b   : > { %v2360_v1 = vpop.f32.mrb[1].mxu1 }
 0x170   : > { %v549_v2 = vpop.f32.mrb[2].mxu1 }
 0x171   : > { %v550_v3 = vadd.f32 %v549_v2, %v399_v63  ;;  %v2365_v4 = vpop.f32.mrb[3].mxu1 }
 0x174   : > { %v715_v5 = vpop.f32.mrb[4].mxu1 }
 0x175   : > { %v721_v6 = vadd.f32 %v715_v5, %v550_v3  ;;  %v2370_v7 = vpop.f32.mrb[5].mxu1 }
 0x178   : > { %v884_v8 = vpop.f32.mrb[6].mxu1 }
 0x179   : > { %v890_v9 = vadd.f32 %v884_v8, %v721_v6  ;;  %v2375_v10 = vpop.f32.mrb[7].mxu1 }
 0x17c   : > { %v1053_v11 = vpop.f32.mrb[8].mxu1 }
 0x17d   : > { %v1059_v12 = vadd.f32 %v1053_v11, %v890_v9  ;;  %v2380_v13 = vpop.f32.mrb[9].mxu1 }
 0x180   : > { %v1222_v14 = vpop.f32.mrb[10].mxu1 }
 0x181   : > { %v1228_v15 = vadd.f32 %v1222_v14, %v1059_v12  ;;  %v2385_v16 = vpop.f32.mrb[11].mxu1 }
 0x187   : > { %v1391_v0 = vpop.f32.mrb[12].mxu1 }
 0x188   : > { %v1397_v17 = vadd.f32 %v1391_v0, %v1228_v15  ;;  %v2390_v18 = vpop.f32.mrb[13].mxu1 }
 0x18b   : > { %v1560_v19 = vpop.f32.mrb[14].mxu1 }
 0x18c   : > { %v1566_v20 = vadd.f32 %v1560_v19, %v1397_v17  ;;  %v2395_v21 = vpop.f32.mrb[15].mxu1 }
 0x192   : > { %v1729_v22 = vpop.f32.mrb[16].mxu1 }
 0x193   : > { %v1735_v24 = vadd.f32 %v1729_v22, %v1566_v20  ;;  %v2400_v25 = vpop.f32.mrb[17].mxu1 }
 0x195   : > { %v1744_v26 = vadd.f32 %v1740_v23, %v1735_v24 }
 0x196   : > { %v1886_v27 = vpop.f32.mrb[18].mxu1 }
 0x197   : > { %1899 = vst.msk [vmem:[#allocation2 + $0x8] sm:$0xf] %vm1898_vm11, %v1744_v26  ;;  %v2405_v28 = vpop.f32.mrb[19].mxu1  ;;  %v1892_v41 = vmax.f32 %v1886_v27, 0.0  ;;  %vm1993_vm11 = vcmask 781952  }
 0x199   : > { %v1917_v46 = vrot.slane %v1892_v41, %v1909_v40 }
 0x19e   : > { %v2124_v13 = vld [vmem:[#allocation2 + $0x8] sm:$0xf] }
 0x1ac   : > { %v1658_v32 = vpop.f32.mrb[0].mxu0 }
 0x1ad   : > { %v1742_v35 = vadd.f32 %v1740_v23, %v1658_v32  ;;  %v1660_v36 = vpop.f32.mrb[1].mxu0 }
 0x1ae   : > { %v1743_v37 = vadd.f32 %v1740_v23, %v1660_v36 }
 0x1b0   : > { %v2874_v38 = vcombine.low %v1742_v35, %v1743_v37  ;;  %v1815_v39 = vpop.f32.mrb[2].mxu0 }
 0x1b1   : > { %v1890_v42 = vmax.f32 %v1815_v39, 0.0  ;;  %v1817_v43 = vpop.f32.mrb[3].mxu0 }
 0x1b2   : > { %1897 = vst [vmem:[#allocation2] sm:$0xff] %v2874_v38  ;;  %v1891_v44 = vmax.f32 %v1817_v43, 0.0 }
 0x1b4   : > { %v1903_v45 = vcombine.low %v1890_v42, %v1891_v44 }
 0x1b6   : > { %v1910_v47 = vrot.slane %v1903_v45, %v1909_v40 }
 0x1b8   : > { %v1918_v48 = vcombine.low %v1910_v47, %v1917_v46 }
 0x1b9   : > { %v2035_v49 = vld [vmem:[#allocation2 + $0x4] sm:$0xf]  ;;  %v1932_v50 = vld [vmem:[#allocation2] sm:$0xf] }
 0x1ba   : > { %1925 = vst.msk [vmem:[#allocation3] sm:$0x3f] %vm1924_vm0, %v1918_v48  ;;  %2037 = vrot.lane.b32.xlu1 %v2035_v49, %s2601_s16  ;;  %1934 = vrot.lane.b32.xlu0 %v1932_v50, %s2592_s11  ;;  %v2047_v51 = vld [vmem:[#allocation2 + $0x4] sm:$0xf]  ;;  %v1926_v52 = vld [vmem:[#allocation2] sm:$0xf] }
 0x1bb   : > { %1928 = vst.msk [vmem:[%s2883_s17] sm:$0xf] %vm1927_vm1, %v1926_v52  ;;  %v1946_v54 = vld [vmem:[#allocation2] sm:$0xf]  ;;  %v2059_v56 = vld [vmem:[#allocation2 + $0x4] sm:$0xf] }
 0x1bc   : > { %v1960_v59 = vld [vmem:[#allocation2] sm:$0xf]  ;;  %v2071_v61 = vld [vmem:[#allocation2 + $0x4] sm:$0xf]  ;;  %vm2000_vm0 = vcmask 779904  }
 0x1bd   : > { %v2107_v63 = vld [vmem:[#allocation2 + $0x4] sm:$0xff]  ;;  %v1974_v2 = vld [vmem:[#allocation2] sm:$0xf] }
 0x1be   : > { %2049 = vrot.lane.b32.xlu0 %v2047_v51, %s2593_s12  ;;  %v2083_v5 = vld [vmem:[#allocation2 + $0x4] sm:$0xf]  ;;  %v1988_v7 = vld [vmem:[#allocation2] sm:$0xf] }
 0x1bf   : > { %v2095_v9 = vld [vmem:[#allocation2 + $0x4] sm:$0xf]  ;;  %v2002_v11 = vld [vmem:[#allocation2] sm:$0xf] }
 0x1c1   : > { %v2041_v53 = vld [vmem:[#allocation3 + $0x2] sm:$0x3]  ;;  %v1939_v55 = vld [vmem:[#allocation3] sm:$0x3]  ;;  %v2130_v16 = vld [vmem:[#allocation3 + $0x4] sm:$0x3] }
 0x1c2   : > { %2043 = vrot.lane.b32.xlu1 %v2041_v53, %s2601_s16  ;;  %1948 = vrot.lane.b32.xlu0 %v1946_v54, %s2602_s25  ;;  %v1929_v57 = vld [vmem:[#allocation3] sm:$0x3]  ;;  %v2053_v58 = vld [vmem:[#allocation3 + $0x2] sm:$0x3]  ;;  %s2334_s16 = sshll.u32 %s2666_s22, 7 }
 0x1c3   : > { %1931 = vst.msk [vmem:[%s2890_s26] sm:$0x3] %vm1930_vm2, %v1929_v57  ;;  %v1953_v60 = vld [vmem:[#allocation3] sm:$0x3]  ;;  %v2065_v62 = vld [vmem:[#allocation3 + $0x2] sm:$0x3] }
 0x1c4   : > { %v1967_v1 = vld [vmem:[#allocation3] sm:$0x3]  ;;  %v2077_v3 = vld [vmem:[#allocation3 + $0x2] sm:$0x3] }
 0x1c5   : > { %v2116_v4 = vld [vmem:[#allocation3 + $0x2] sm:$0xf]  ;;  %v1981_v6 = vld [vmem:[#allocation3] sm:$0x3] }
 0x1c6   : > { %1941 = vrot.lane.b32.xlu1 %v1939_v55, %s2592_s11  ;;  %2061 = vrot.lane.b32.xlu0 %v2059_v56, %s2595_s14  ;;  %s2605_s11 = smov 100   ;;  %v2026_v8 = vld [vmem:[#allocation3] sm:$0xf] }
 0x1c7   : > { %v2089_v10 = vld [vmem:[#allocation3 + $0x2] sm:$0x3]  ;;  %v1995_v12 = vld [vmem:[#allocation3] sm:$0x3] }
 0x1c8   : > { %v2101_v14 = vld [vmem:[#allocation3 + $0x2] sm:$0x3]  ;;  %v2009_v15 = vld [vmem:[#allocation3] sm:$0x3] }
 0x1ca   : > { %2055 = vrot.lane.b32.xlu1 %v2053_v58, %s2593_s12  ;;  %1962 = vrot.lane.b32.xlu0 %v1960_v59, %s2603_s30  ;;  %s2607_s12 = smov 114  }
 0x1ce   : > { %1955 = vrot.lane.b32.xlu1 %v1953_v60, %s2602_s25  ;;  %2073 = vrot.lane.b32.xlu0 %v2071_v61, %s2604_s6 }
 0x1d2   : > { %2067 = vrot.lane.b32.xlu1 %v2065_v62, %s2595_s14  ;;  %2109 = vrot.lane.b32.xlu0 %v2107_v63, %s2605_s11  ;;  %s2609_s14 = smov 118  }
 0x1d6   : > { %1969 = vrot.lane.b32.xlu1 %v1967_v1, %s2603_s30  ;;  %1976 = vrot.lane.b32.xlu0 %v1974_v2, %s2606_s7 }
 0x1da   : > { %2079 = vrot.lane.b32.xlu1 %v2077_v3, %s2604_s6  ;;  %2018 = vrot.lane.b32.xlu0 %v2874_v38, %s2607_s12  ;;  %s2934_s6 = scalar_lea.hbm %s3026_s4, %s2334_s16 }
 0x1de   : > { %2118 = vrot.lane.b32.xlu1 %v2116_v4, %s2605_s11  ;;  %2085 = vrot.lane.b32.xlu0 %v2083_v5, %s2608_s8  ;;  %s2137_s11 = scalar_lea.sflag [#allocation5], %s2878_s13 }
 0x1e2   : > { %1983 = vrot.lane.b32.xlu1 %v1981_v6, %s2606_s7  ;;  %1990 = vrot.lane.b32.xlu0 %v1988_v7, %s2609_s14  ;;  %s2493_s7 = scalar_lea.vmem %s2936_s23, 128 }
 0x1e3   : > { %p2494_p11 = scmp.ne.s32.totalorder %s2936_s23, %s2493_s7 }
 0x1e5   : > { %p2495_p12 = pnand %p2494_p11, %p2683_p5 }
 0x1e6   : > { %2028 = vrot.lane.b32.xlu1 %v2026_v8, %s2607_s12  ;;  %2097 = vrot.lane.b32.xlu0 %v2095_v9, %s2610_s9  ;;  %s2613_s12 = smov [#allocation4]  }
 0x1e7   : > { %p2496_p13 = pneg %p2495_p12 }
 0x1ea   : > { %2091 = vrot.lane.b32.xlu1 %v2089_v10, %s2608_s8  ;;  %2004 = vrot.lane.b32.xlu0 %v2002_v11, %s2611_s10  ;;  %s2497_s8 = sshll.u32 %s2613_s12, 4  ;;  %s2498_s8 = int_to_ptr.vmem [resolvable:$false] %s2497_s8 }
 0x1eb   : > { %p2500_p0 = scmp.lt.s32.totalorder %s2936_s23, %s2498_s8 }
 0x1ee   : > { %1997 = vrot.lane.b32.xlu1 %v1995_v12, %s2609_s14  ;;  %2126 = vrot.lane.b32.xlu0 %v2124_v13, %s2612_s15  ;;  %s2499_s14 = scalar_lea.vmem %s2498_s8, 256 }
 0x1ef   : > { %p2501_p1 = scmp.lt.s32.totalorder %s2499_s14, %s2493_s7 }
 0x1f1   : > { %p2502_p2 = por %p2501_p1, %p2500_p0 }
 0x1f2   : > { %2103 = vrot.lane.b32.xlu1 %v2101_v14, %s2610_s9 }
 0x1f3   : > { %p2503_p3 = pnand %p2502_p2, %p2496_p13 }
 0x1f6   : > { %2011 = vrot.lane.b32.xlu1 %v2009_v15, %s2611_s10 }
 0x1fa   : > { %2132 = vrot.lane.b32.xlu1 %v2130_v16, %s2612_s15 }
 0x22c   : > { %v2038_v0 = vpop.permute.xlu1 %2037  ;;  %v1935_v17 = vpop.permute.xlu0 %1934 }
 0x22d   : > { %2040 = vst.msk [vmem:[%s2883_s17 + $0x4] sm:$0xf] %vm1927_vm1, %v2038_v0 }
 0x22e   : > { %1938 = vst.msk [vmem:[%s2883_s17] sm:$0xf] %vm1937_vm3, %v1935_v17 }
 0x230   : > { %v2050_v18 = vpop.permute.xlu0 %2049 }
 0x231   : > { %2052 = vst.msk [vmem:[%s2883_s17 + $0x4] sm:$0xf] %vm1937_vm3, %v2050_v18 }
 0x234   : > { %v2044_v19 = vpop.permute.xlu1 %2043  ;;  %v1949_v20 = vpop.permute.xlu0 %1948 }
 0x235   : > { %2046 = vst.msk [vmem:[%s2890_s26 + $0x2] sm:$0x3] %vm1930_vm2, %v2044_v19 }
 0x236   : > { %1952 = vst.msk [vmem:[%s2883_s17] sm:$0xf] %vm1951_vm4, %v1949_v20 }
 0x238   : > { %v1942_v21 = vpop.permute.xlu1 %1941  ;;  %v2062_v22 = vpop.permute.xlu0 %2061 }
 0x239   : > { %1945 = vst.msk [vmem:[%s2890_s26] sm:$0x3] %vm1944_vm5, %v1942_v21 }
 0x23a   : > { %2064 = vst.msk [vmem:[%s2883_s17 + $0x4] sm:$0xf] %vm1951_vm4, %v2062_v22 }
 0x23c   : > { %v2056_v23 = vpop.permute.xlu1 %2055  ;;  %v1963_v24 = vpop.permute.xlu0 %1962 }
 0x23d   : > { %2058 = vst.msk [vmem:[%s2890_s26 + $0x2] sm:$0x3] %vm1944_vm5, %v2056_v23 }
 0x23e   : > { %1966 = vst.msk [vmem:[%s2883_s17] sm:$0xf] %vm1965_vm6, %v1963_v24 }
 0x240   : > { %v1956_v25 = vpop.permute.xlu1 %1955  ;;  %v2074_v26 = vpop.permute.xlu0 %2073 }
 0x241   : > { %1959 = vst.msk [vmem:[%s2890_s26] sm:$0x3] %vm1958_vm7, %v1956_v25 }
 0x242   : > { %2076 = vst.msk [vmem:[%s2883_s17 + $0x4] sm:$0xf] %vm1965_vm6, %v2074_v26 }
 0x244   : > { %v2068_v27 = vpop.permute.xlu1 %2067  ;;  %v2110_v28 = vpop.permute.xlu0 %2109 }
 0x245   : > { %2070 = vst.msk [vmem:[%s2890_s26 + $0x2] sm:$0x3] %vm1958_vm7, %v2068_v27  ;;  %v2111_v37 = vrot.slane %v2110_v28, 4 }
 0x247   : > { %v2113_v40 = vsel %vm2112_vm12, %v2110_v28, %v2111_v37 }
 0x248   : > { %v1970_v29 = vpop.permute.xlu1 %1969  ;;  %v1977_v30 = vpop.permute.xlu0 %1976 }
 0x249   : > { %1973 = vst.msk [vmem:[%s2890_s26] sm:$0x3] %vm1972_vm8, %v1970_v29 }
 0x24a   : > { %1980 = vst.msk [vmem:[%s2883_s17] sm:$0xf] %vm1979_vm9, %v1977_v30 }
 0x24c   : > { %v2080_v31 = vpop.permute.xlu1 %2079  ;;  %v2019_v32 = vpop.permute.xlu0 %2018 }
 0x24d   : > { %2082 = vst.msk [vmem:[%s2890_s26 + $0x2] sm:$0x3] %vm1972_vm8, %v2080_v31  ;;  %v2020_v41 = vrot.slane %v2019_v32, 4 }
 0x24f   : > { %v2022_v44 = vsel %vm2021_vm14, %v2019_v32, %v2020_v41 }
 0x250   : > { %v2914_v33 = vpop.permute.xlu1 %2118  ;;  %v2086_v34 = vpop.permute.xlu0 %2085 }
 0x251   : > { %2088 = vst.msk [vmem:[%s2883_s17 + $0x4] sm:$0xf] %vm1979_vm9, %v2086_v34  ;;  %v2120_v47 = vrot.slane %v2914_v33, 2 }
 0x254   : > { %v1984_v35 = vpop.permute.xlu1 %1983  ;;  %v1991_v36 = vpop.permute.xlu0 %1990 }
 0x255   : > { %1987 = vst.msk [vmem:[%s2890_s26] sm:$0x3] %vm1986_vm10, %v1984_v35 }
 0x256   : > { %1994 = vst.msk [vmem:[%s2883_s17] sm:$0xf] %vm1993_vm11, %v1991_v36 }
 0x258   : > { %v2029_v38 = vpop.permute.xlu1 %2028  ;;  %v2098_v39 = vpop.permute.xlu0 %2097 }
 0x259   : > { %2100 = vst.msk [vmem:[%s2883_s17 + $0x4] sm:$0xf] %vm1993_vm11, %v2098_v39 }
 0x25a   : > { %2115 = vst.msk [vmem:[%s2883_s17 + $0x4] sm:$0xf] %vm2007_vm13, %v2113_v40 }
 0x25c   : > { %v2092_v42 = vpop.permute.xlu1 %2091  ;;  %v2005_v43 = vpop.permute.xlu0 %2004 }
 0x25d   : > { %2094 = vst.msk [vmem:[%s2890_s26 + $0x2] sm:$0x3] %vm1986_vm10, %v2092_v42 }
 0x25e   : > { %2008 = vst.msk [vmem:[%s2883_s17] sm:$0xf] %vm2007_vm13, %v2005_v43 }
 0x25f   : > { %2025 = vst.msk [vmem:[%s2883_s17] sm:$0xf] %vm2024_vm15, %v2022_v44 }
 0x260   : > { %v1998_v45 = vpop.permute.xlu1 %1997  ;;  %v2127_v46 = vpop.permute.xlu0 %2126 }
 0x261   : > { %2001 = vst.msk [vmem:[%s2890_s26] sm:$0x3] %vm2000_vm0, %v1998_v45 }
 0x262   : > { %2129 = vst.msk [vmem:[%s2883_s17 + $0x4] sm:$0xf] %vm2024_vm15, %v2127_v46 }
 0x263   : > { %2506 = shalt.err (!%p2503_p3)
}
 0x264   : > { %s2507_s17 = scalar_lea.hbm %s2934_s6, 128  ;;  %s2511_s15 = scalar_lea.hbm %s3026_s4, 256 }
 0x265   : > { %p2508_p4 = scmp.ne.s32.totalorder %s2934_s6, %s2507_s17  ;;  %p2512_p9 = scmp.lt.u32.totalorder %s2934_s6, %s3026_s4 }
 0x266   : > { %p2513_p10 = scmp.lt.u32.totalorder %s2511_s15, %s2507_s17  ;;  %p2515_p12 = scmp.lt.u32.totalorder %s2507_s17, %s2934_s6 }
 0x267   : > { %p2509_p7 = pnand %p2508_p4, %p2683_p5 }
 0x268   : > { %p2514_p11 = por %p2513_p10, %p2512_p9 }
 0x269   : > { %p2510_p8 = pneg %p2509_p7 }
 0x26a   : > { %p2516_p13 = por %p2515_p12, %p2514_p11 }
 0x26c   : > { %p2517_p0 = pnand %p2516_p13, %p2510_p8 }
 0x26e   : > { %2520 = shalt.err (!%p2517_p0)
}
 0x26f   : > { %2423 = dma.vmem_to_hbm [thread:$0]  (%p2683_p5), %s2936_s23, 128, %s2934_s6, %s2137_s11   ;;  %vm2014_vm1 = vcmask 911104   ;;  %v2104_v48 = vpop.permute.xlu1 %2103  ;;  %v2121_v49 = vsel %vm2112_vm12, %v2914_v33, %v2120_v47  ;;  %v2030_v50 = vrot.slane %v2029_v38, 2  ;;  %vm2033_vm2 = vcmask 1042304  }
 0x270   : > { %2106 = vst.msk [vmem:[%s2890_s26 + $0x2] sm:$0x3] %vm2000_vm0, %v2104_v48  ;;  %s2335_s30 = sshll.u32 %s2666_s22, 6  ;;  %s2170_s7 = sshll.u32 %s2890_s26, 4  ;;  %s2980_s7 = int_to_ptr.vmem [resolvable:$true] %s2170_s7 }
 0x271   : > { %2123 = vst.msk [vmem:[%s2890_s26 + $0x2] sm:$0x3] %vm2014_vm1, %v2121_v49  ;;  %v2031_v52 = vsel %vm2021_vm14, %v2029_v38, %v2030_v50  ;;  %s2978_s11 = scalar_lea.hbm %s3027_s5, %s2335_s30  ;;  %s2142_s12 = scalar_lea.sflag [#allocation7], %s2878_s13 }
 0x272   : > { %s2521_s8 = scalar_lea.vmem %s2980_s7, 64  ;;  %s2614_s22 = smov [#allocation6]  }
 0x273   : > { %v2012_v51 = vpop.permute.xlu1 %2011  ;;  %p2522_p1 = scmp.ne.s32.totalorder %s2980_s7, %s2521_s8  ;;  %s2525_s14 = sshll.u32 %s2614_s22, 4  ;;  %s2526_s14 = int_to_ptr.vmem [resolvable:$false] %s2525_s14 }
 0x274   : > { %2015 = vst.msk [vmem:[%s2890_s26] sm:$0x3] %vm2014_vm1, %v2012_v51  ;;  %s2527_s17 = scalar_lea.vmem %s2526_s14, 128  ;;  %p2528_p4 = scmp.lt.s32.totalorder %s2980_s7, %s2526_s14 }
 0x275   : > { %2034 = vst.msk [vmem:[%s2890_s26] sm:$0x3] %vm2033_vm2, %v2031_v52  ;;  %p2523_p2 = pnand %p2522_p1, %p2683_p5  ;;  %p2529_p7 = scmp.lt.s32.totalorder %s2527_s17, %s2521_s8 }
 0x277   : > { %v2133_v53 = vpop.permute.xlu1 %2132  ;;  %p2524_p3 = pneg %p2523_p2  ;;  %p2530_p8 = por %p2529_p7, %p2528_p4 }
 0x278   : > { %2135 = vst.msk [vmem:[%s2890_s26 + $0x2] sm:$0x3] %vm2033_vm2, %v2133_v53 }
 0x279   : > { %p2531_p9 = pnand %p2530_p8, %p2524_p3 }
 0x27b   : > { %2534 = shalt.err (!%p2531_p9)
}
 0x27c   : > { %s2535_s13 = scalar_lea.hbm %s2978_s11, 64  ;;  %s2539_s10 = scalar_lea.hbm %s3027_s5, 128 }
 0x27d   : > { %p2536_p10 = scmp.ne.s32.totalorder %s2978_s11, %s2535_s13  ;;  %p2540_p13 = scmp.lt.u32.totalorder %s2978_s11, %s3027_s5 }
 0x27e   : > { %p2541_p0 = scmp.lt.u32.totalorder %s2539_s10, %s2535_s13  ;;  %p2543_p2 = scmp.lt.u32.totalorder %s2535_s13, %s2978_s11 }
 0x27f   : > { %p2537_p11 = pnand %p2536_p10, %p2683_p5 }
 0x280   : > { %p2542_p1 = por %p2541_p0, %p2540_p13 }
 0x281   : > { %p2538_p12 = pneg %p2537_p11 }
 0x282   : > { %p2544_p3 = por %p2543_p2, %p2542_p1 }
 0x284   : > { %p2545_p4 = pnand %p2544_p3, %p2538_p12 }
 0x286   : > { %2548 = shalt.err (!%p2545_p4)
}
 0x287   : > { %2424 = dma.vmem_to_hbm [thread:$0]  (%p2683_p5), %s2980_s7, 64, %s2978_s11, %s2142_s12  }
 0x288 PF: > { %p2434_p7 = scmp.ge.s32.totalorder %s2587_s21, 2  ;;  %s2182_s25 = sand.u32 1, %s2575_s18  }
 0x289   : > { %s2183_s30 = scalar_lea.sflag [#allocation5], %s2182_s25 }
 0x28a   : > { %p2428_p8 = pnand %p2434_p7, %p2687_p6 }
 0x28c   : > { %2566 = dma.done.wait (!%p2428_p8), %s2183_s30, 128  }
 0x28d   : > { %2568 = vsyncadd (!%p2428_p8), %s2183_s30, 4294967168  ;;  %s2192_s23 = scalar_lea.sflag [#allocation7], %s2182_s25 }
 0x28e   : > { %2570 = dma.done.wait (!%p2428_p8), %s2192_s23, 64  }
 0x28f   : > { %2572 = vsyncadd (!%p2428_p8), %s2192_s23, 4294967232  ;;  %p19_p5 = scmp.ge.s32.totalorder %s2670_s24, 4   ;;  %s3030_s18 = smov %s2579_s19 }
 0x290   : > { %s3031_s19 = smov %s2583_s20  ;;  %s3032_s20 = smov %s2681_s27 }
 0x291   : > { %s3033_s21 = smov %s2670_s24  ;;  %21 = sbr.rel (!%p19_p5) target bundleno = 5 (0x5), region = 96 }
 0x298   :  { %2197 = vsyncpa [#allocation5], 1 }
 0x299   :  { %2199 = vsyncpa [#allocation5 + $0x1], 1 }
 0x29a   :  { %2200 = vsyncpa [#allocation7], 1 }
 0x29b   :  { %2202 = vsyncpa [#allocation7 + $0x1], 1 }

</bundles_post_ra>
